<compile_context>
chip_gen: v5e
topology: v5e:2x2
jax: 0.10.0
libtpu: 0.0.40
codegen_flags: <defaults>
</compile_context>

<pallas_src>
import functools

import jax
import jax.numpy as jnp
from jax import lax
from jax.experimental import pallas as pl
from jax.experimental.pallas import tpu as pltpu


# ----------------------------------------------------------------------------
# Pallas kernel: in-kernel im2col (9 shifted lane-slices of the padded image)
# -> 9 accumulated MXU matmuls -> +b1 -> ReLU -> folded 1x1 matmul -> +bias.
# Shapes (per grid step):
#   xf_ref  : (nb, Cin, L)   bf16   L = (H+2)*(W+2) + 2  (flat padded image + halo)
#   w1_ref  : (9, Clat, Cin) bf16   per-tap conv1 weights, tap t = dy*3 + dx
#   b1_ref  : (Clat, 1)      f32    conv1 bias
#   w2t_ref : (Cout, Clat)   bf16   folded (BN1 . conv1x1 . BN2) weight, transposed
#   bias_ref: (Cout, 1)      f32    folded bias
#   o_ref   : (nb, Cout, M)  f32    M = H*(W+2); valid W columns cropped on host
# ----------------------------------------------------------------------------
def _detector_head_kernel(xf_ref, w1_ref, b1_ref, w2t_ref, bias_ref, o_ref, *, Wp):
    nb = xf_ref.shape[0]
    M = o_ref.shape[2]

    b1 = b1_ref[...]          # (Clat, 1) f32
    w2t = w2t_ref[...]        # (Cout, Clat) bf16
    bias = bias_ref[...]      # (Cout, 1) f32

    for b in range(nb):
        acc = None
        for dy in range(3):
            for dx in range(3):
                t = dy * 3 + dx
                s = dy * Wp + dx                      # static lane offset of this tap
                x_tap = xf_ref[b, :, s:s + M]         # (Cin, M) bf16, contiguous slice
                part = jnp.dot(w1_ref[t], x_tap,
                               preferred_element_type=jnp.float32)   # (Clat, M) f32
                acc = part if acc is None else acc + part
        h = jnp.maximum(acc + b1, 0.0)                # bias + ReLU in f32 (v5e-friendly)
        y = jnp.dot(w2t, h.astype(w2t.dtype),
                    preferred_element_type=jnp.float32)              # (Cout, M) f32
        o_ref[b] = (y + bias).astype(o_ref.dtype)


# ----------------------------------------------------------------------------
# Block-size / VMEM heuristics.
# ----------------------------------------------------------------------------
def _per_step_vmem_bytes(nb, Cin, Clat, Cout, L, M):
    in_b = 2 * nb * Cin * L * 2                 # bf16 input block, double-buffered
    out_b = 2 * nb * Cout * M * 4               # f32 output block, double-buffered
    wts = 9 * Clat * Cin * 2 + Clat * 4 + Cout * Clat * 2 + Cout * 4
    inter = nb * (Clat * M * 4 + Clat * M * 2 + Cout * M * 4)   # acc + bf16 h + y
    return in_b + out_b + wts + inter


def _vmem_limit_bytes(nb, Cin, Clat, Cout, L, M):
    est = _per_step_vmem_bytes(nb, Cin, Clat, Cout, L, M)
    # Raise above the 16 MiB v5e default when needed, stay <48 MiB (v7x has 64 MiB).
    return int(min(max(32 << 20, 2 * est), 48 << 20))


def _pick_images_per_step(N, Cin, Clat, Cout, L, M, budget=40 << 20):
    """nb must divide N and fit the VMEM budget.  Prefer an even number of grid
    steps (v7x: 2 TensorCores), then the largest nb (amortize ~0.35us/step on
    the single-TC v5e/v6e), with a cap on unrolled work per step."""
    best, best_key = 1, None
    for nb in range(1, N + 1):
        if N % nb:
            continue
        if nb > 1 and (_per_step_vmem_bytes(nb, Cin, Clat, Cout, L, M) > budget
                       or nb * M > 4096):
            continue
        steps = N // nb
        key = (steps % 2 == 0, nb)
        if best_key is None or key > best_key:
            best, best_key = nb, key
    return best


# ----------------------------------------------------------------------------
# Host wrapper.
# ----------------------------------------------------------------------------
def detector_head_pallas(x_nchw, params, *, mxu_dtype=jnp.bfloat16):
    """x_nchw: (N, Cin, H, W) float32 -> (N, Cout, H, W) float32."""
    (w1, b1, s1, t1, w2, b2, s2, t2) = params
    N, Cin, H, W = x_nchw.shape
    Clat = w1.shape[3]
    Cout = w2.shape[1]
    Hp, Wp = H + 2, W + 2
    L = Hp * Wp + 2           # flat padded image + 1-element halo each side
    M = H * Wp                # per-image output columns before cropping W

    # ---- host-side prep (cheap; no 9x im2col blow-up) -----------------------
    # Cast to bf16 FIRST, zero-pad spatially (SAME 3x3 conv), flatten
    # channel-major, add a 1-element halo so every 3x3 tap is a contiguous
    # lane-slice xf[:, s : s+M] with s = dy*Wp + dx.
    xp = jnp.pad(x_nchw.astype(mxu_dtype), ((0, 0), (0, 0), (1, 1), (1, 1)))
    xf = jnp.pad(xp.reshape(N, Cin, Hp * Wp), ((0, 0), (0, 0), (1, 1)))   # (N,Cin,L)

    # Fold BN1 (post-ReLU affine), conv2 bias and BN2 into the 1x1 conv:
    #   ((relu(c1)*s1 + t1) @ w2 + b2) * s2 + t2
    #     = relu(c1) @ (s1[:,None]*w2*s2[None,:]) + ((t1 @ w2 + b2)*s2 + t2)
    w2_fold = (s1[:, None] * w2) * s2[None, :]                  # (Clat, Cout)
    bias_fold = (t1 @ w2 + b2) * s2 + t2                        # (Cout,)

    # Per-tap conv1 weights, channel-major: w1_taps[dy*3+dx] = w1[dy, dx].T
    w1_taps = jnp.transpose(w1, (0, 1, 3, 2)).reshape(9, Clat, Cin).astype(mxu_dtype)
    b1_col = b1.reshape(Clat, 1).astype(jnp.float32)
    w2t = jnp.transpose(w2_fold).astype(mxu_dtype)              # (Cout, Clat) bf16
    bias_col = bias_fold.reshape(Cout, 1).astype(jnp.float32)

    nb = _pick_images_per_step(N, Cin, Clat, Cout, L, M)
    grid = (N // nb,)

    out_flat = pl.pallas_call(
        functools.partial(_detector_head_kernel, Wp=Wp),
        out_shape=jax.ShapeDtypeStruct((N, Cout, M), jnp.float32),
        grid_spec=pltpu.PrefetchScalarGridSpec(
            num_scalar_prefetch=0,
            grid=grid,
            in_specs=[
                pl.BlockSpec((nb, Cin, L), lambda n: (n, 0, 0)),
                pl.BlockSpec((9, Clat, Cin), lambda n: (0, 0, 0)),
                pl.BlockSpec((Clat, 1), lambda n: (0, 0)),
                pl.BlockSpec((Cout, Clat), lambda n: (0, 0)),
                pl.BlockSpec((Cout, 1), lambda n: (0, 0)),
            ],
            out_specs=pl.BlockSpec((nb, Cout, M), lambda n: (n, 0, 0)),
        ),
        compiler_params=pltpu.CompilerParams(
            dimension_semantics=("parallel",),
            vmem_limit_bytes=_vmem_limit_bytes(nb, Cin, Clat, Cout, L, M),
        ),
    )(xf, w1_taps, b1_col, w2t, bias_col)

    # Output is already channel-major; drop the 2 pad columns per spatial row.
    return out_flat.reshape(N, Cout, H, Wp)[:, :, :, 1:1 + W]


# ----------------------------------------------------------------------------
# Deterministic parameter construction (synthetic init, no checkpoint).
# ----------------------------------------------------------------------------
def make_params(key, Cin, Clat, Cout, eps=1e-5):
    ks = jax.random.split(key, 10)
    # conv weights in HWIO layout.
    w1 = jax.random.normal(ks[0], (3, 3, Cin, Clat), jnp.float32) * 0.05
    b1 = jax.random.normal(ks[1], (Clat,), jnp.float32) * 0.05
    # BatchNorm2d(lat): gamma, beta, running_mean, running_var
    g1 = 1.0 + 0.1 * jax.random.normal(ks[2], (Clat,), jnp.float32)
    be1 = 0.1 * jax.random.normal(ks[3], (Clat,), jnp.float32)
    m1 = 0.1 * jax.random.normal(ks[4], (Clat,), jnp.float32)
    v1 = jax.random.uniform(ks[5], (Clat,), jnp.float32, 0.5, 1.5)

    w2 = jax.random.normal(ks[6], (Clat, Cout), jnp.float32) * 0.05
    b2 = jax.random.normal(ks[7], (Cout,), jnp.float32) * 0.05
    # BatchNorm2d(out)
    g2 = 1.0 + 0.1 * jax.random.normal(ks[8], (Cout,), jnp.float32)
    be2 = 0.1 * jax.random.normal(ks[9], (Cout,), jnp.float32)
    m2 = jnp.zeros((Cout,), jnp.float32) + 0.05
    v2 = jnp.ones((Cout,), jnp.float32) * 1.2

    # Fold BN (eval mode) into per-channel scale/shift: y = x*s + t
    s1 = g1 / jnp.sqrt(v1 + eps)
    t1 = be1 - m1 * s1
    s2 = g2 / jnp.sqrt(v2 + eps)
    t2 = be2 - m2 * s2
    return (w1, b1, s1, t1, w2, b2, s2, t2)


# ----------------------------------------------------------------------------
# Pure-JAX reference (same math, via lax.conv) for a correctness check.
# ----------------------------------------------------------------------------
def reference(x_nchw, params):
    (w1, b1, s1, t1, w2, b2, s2, t2) = params
    x = jnp.transpose(x_nchw, (0, 2, 3, 1))
    dn = ('NHWC', 'HWIO', 'NHWC')
    y = lax.conv_general_dilated(x, w1, (1, 1), 'SAME', dimension_numbers=dn)
    y = jnp.maximum(y + b1, 0.0)
    y = y * s1 + t1
    y = lax.conv_general_dilated(y, w2[None, None], (1, 1), 'VALID',
                                 dimension_numbers=dn)
    y = (y + b2) * s2 + t2
    return jnp.transpose(y, (0, 3, 1, 2))


if __name__ == "__main__":
    # Small shapes consistent with the module (DetectorHead defaults scaled down):
    # in_channels=8, lat_channels=128, out_channels=1, batch=2, spatial=16.
    N, Cin, H, W = 2, 8, 16, 16
    Clat, Cout = 128, 1

    key = jax.random.PRNGKey(0)
    kx, kp = jax.random.split(key)
    x = jax.random.normal(kx, (N, Cin, H, W), jnp.float32)
    params = make_params(kp, Cin, Clat, Cout)

    out = jax.block_until_ready(detector_head_pallas(x, params))
    ref = jax.block_until_ready(reference(x, params))

    assert out.shape == (N, Cout, H, W), out.shape
    # bf16 MXU operands (f32 accumulation) -> tolerance relaxed vs the f32 reference.
    max_err = float(jnp.max(jnp.abs(out - ref)))
    assert jnp.allclose(out, ref, atol=2e-2, rtol=2e-2), max_err

    print("KERNEL_OK")
</pallas_src>

<mosaic_0001>
module attributes {stable_mosaic.version = 11 : i64} {
  func.func @_detector_head_kernel(%arg0: i32, %arg1: memref<1x8x326xbf16, #tpu.memory_space<vmem>>, %arg2: memref<9x128x8xbf16, #tpu.memory_space<vmem>>, %arg3: memref<128x1xf32, #tpu.memory_space<vmem>>, %arg4: memref<1x128xbf16, #tpu.memory_space<vmem>>, %arg5: memref<1x1xf32, #tpu.memory_space<vmem>>, %arg6: memref<1x1x288xf32, #tpu.memory_space<vmem>>) attributes {dimension_semantics = [#tpu.dimension_semantics<parallel>], iteration_bounds = array<i64: 2>, scalar_prefetch = 0 : i64, scratch_operands = 0 : i64, tpu.core_type = #tpu.core_type<tc>, window_params = [{transform_indices = @transform_0, window_bounds = array<i64: 1, 8, 326>}, {pipeline_mode = #tpu.pipeline_mode<synchronous>, transform_indices = @transform_1, window_bounds = array<i64: 9, 128, 8>}, {pipeline_mode = #tpu.pipeline_mode<synchronous>, transform_indices = @transform_2, window_bounds = array<i64: 128, 1>}, {pipeline_mode = #tpu.pipeline_mode<synchronous>, transform_indices = @transform_3, window_bounds = array<i64: 1, 128>}, {pipeline_mode = #tpu.pipeline_mode<synchronous>, transform_indices = @transform_4, window_bounds = array<i64: 1, 1>}, {transform_indices = @transform_5, window_bounds = array<i64: 1, 1, 288>}]} {
    %c0 = arith.constant 0 : index
    %c0_0 = arith.constant 0 : index
    %0 = vector.load %arg3[%c0, %c0_0] : memref<128x1xf32, #tpu.memory_space<vmem>>, vector<128x1xf32>
    %c0_1 = arith.constant 0 : index
    %c0_2 = arith.constant 0 : index
    %1 = vector.load %arg4[%c0_1, %c0_2] : memref<1x128xbf16, #tpu.memory_space<vmem>>, vector<1x128xbf16>
    %c0_3 = arith.constant 0 : index
    %c0_4 = arith.constant 0 : index
    %2 = vector.load %arg5[%c0_3, %c0_4] : memref<1x1xf32, #tpu.memory_space<vmem>>, vector<1x1xf32>
    %c0_5 = arith.constant 0 : index
    %c0_6 = arith.constant 0 : index
    %c0_7 = arith.constant 0 : index
    %3 = vector.load %arg1[%c0_5, %c0_6, %c0_7] : memref<1x8x326xbf16, #tpu.memory_space<vmem>>, vector<1x8x288xbf16>
    %4 = vector.shape_cast %3 : vector<1x8x288xbf16> to vector<8x288xbf16>
    %c0_8 = arith.constant 0 : index
    %c0_9 = arith.constant 0 : index
    %c0_10 = arith.constant 0 : index
    %5 = vector.load %arg2[%c0_8, %c0_9, %c0_10] : memref<9x128x8xbf16, #tpu.memory_space<vmem>>, vector<1x128x8xbf16>
    %6 = vector.shape_cast %5 : vector<1x128x8xbf16> to vector<128x8xbf16>
    %cst = arith.constant dense<0.000000e+00> : vector<128x288xf32>
    %7 = tpu.matmul %6, %4, %cst {dimension_numbers = #tpu.dot_dimension_numbers<[1], [0], [0], [1], [0, 0, 1, 1], [], []>} : vector<128x8xbf16>, vector<8x288xbf16>, vector<128x288xf32> -> vector<128x288xf32>
    %c0_11 = arith.constant 0 : index
    %c0_12 = arith.constant 0 : index
    %c1 = arith.constant 1 : index
    %8 = vector.load %arg1[%c0_11, %c0_12, %c1] : memref<1x8x326xbf16, #tpu.memory_space<vmem>>, vector<1x8x288xbf16>
    %9 = vector.shape_cast %8 : vector<1x8x288xbf16> to vector<8x288xbf16>
    %c1_13 = arith.constant 1 : index
    %c0_14 = arith.constant 0 : index
    %c0_15 = arith.constant 0 : index
    %10 = vector.load %arg2[%c1_13, %c0_14, %c0_15] : memref<9x128x8xbf16, #tpu.memory_space<vmem>>, vector<1x128x8xbf16>
    %11 = vector.shape_cast %10 : vector<1x128x8xbf16> to vector<128x8xbf16>
    %cst_16 = arith.constant dense<0.000000e+00> : vector<128x288xf32>
    %12 = tpu.matmul %11, %9, %cst_16 {dimension_numbers = #tpu.dot_dimension_numbers<[1], [0], [0], [1], [0, 0, 1, 1], [], []>} : vector<128x8xbf16>, vector<8x288xbf16>, vector<128x288xf32> -> vector<128x288xf32>
    %13 = arith.addf %7, %12 : vector<128x288xf32>
    %c0_17 = arith.constant 0 : index
    %c0_18 = arith.constant 0 : index
    %c2 = arith.constant 2 : index
    %14 = vector.load %arg1[%c0_17, %c0_18, %c2] : memref<1x8x326xbf16, #tpu.memory_space<vmem>>, vector<1x8x288xbf16>
    %15 = vector.shape_cast %14 : vector<1x8x288xbf16> to vector<8x288xbf16>
    %c2_19 = arith.constant 2 : index
    %c0_20 = arith.constant 0 : index
    %c0_21 = arith.constant 0 : index
    %16 = vector.load %arg2[%c2_19, %c0_20, %c0_21] : memref<9x128x8xbf16, #tpu.memory_space<vmem>>, vector<1x128x8xbf16>
    %17 = vector.shape_cast %16 : vector<1x128x8xbf16> to vector<128x8xbf16>
    %cst_22 = arith.constant dense<0.000000e+00> : vector<128x288xf32>
    %18 = tpu.matmul %17, %15, %cst_22 {dimension_numbers = #tpu.dot_dimension_numbers<[1], [0], [0], [1], [0, 0, 1, 1], [], []>} : vector<128x8xbf16>, vector<8x288xbf16>, vector<128x288xf32> -> vector<128x288xf32>
    %19 = arith.addf %13, %18 : vector<128x288xf32>
    %c0_23 = arith.constant 0 : index
    %c0_24 = arith.constant 0 : index
    %c18 = arith.constant 18 : index
    %20 = vector.load %arg1[%c0_23, %c0_24, %c18] : memref<1x8x326xbf16, #tpu.memory_space<vmem>>, vector<1x8x288xbf16>
    %21 = vector.shape_cast %20 : vector<1x8x288xbf16> to vector<8x288xbf16>
    %c3 = arith.constant 3 : index
    %c0_25 = arith.constant 0 : index
    %c0_26 = arith.constant 0 : index
    %22 = vector.load %arg2[%c3, %c0_25, %c0_26] : memref<9x128x8xbf16, #tpu.memory_space<vmem>>, vector<1x128x8xbf16>
    %23 = vector.shape_cast %22 : vector<1x128x8xbf16> to vector<128x8xbf16>
    %cst_27 = arith.constant dense<0.000000e+00> : vector<128x288xf32>
    %24 = tpu.matmul %23, %21, %cst_27 {dimension_numbers = #tpu.dot_dimension_numbers<[1], [0], [0], [1], [0, 0, 1, 1], [], []>} : vector<128x8xbf16>, vector<8x288xbf16>, vector<128x288xf32> -> vector<128x288xf32>
    %25 = arith.addf %19, %24 : vector<128x288xf32>
    %c0_28 = arith.constant 0 : index
    %c0_29 = arith.constant 0 : index
    %c19 = arith.constant 19 : index
    %26 = vector.load %arg1[%c0_28, %c0_29, %c19] : memref<1x8x326xbf16, #tpu.memory_space<vmem>>, vector<1x8x288xbf16>
    %27 = vector.shape_cast %26 : vector<1x8x288xbf16> to vector<8x288xbf16>
    %c4 = arith.constant 4 : index
    %c0_30 = arith.constant 0 : index
    %c0_31 = arith.constant 0 : index
    %28 = vector.load %arg2[%c4, %c0_30, %c0_31] : memref<9x128x8xbf16, #tpu.memory_space<vmem>>, vector<1x128x8xbf16>
    %29 = vector.shape_cast %28 : vector<1x128x8xbf16> to vector<128x8xbf16>
    %cst_32 = arith.constant dense<0.000000e+00> : vector<128x288xf32>
    %30 = tpu.matmul %29, %27, %cst_32 {dimension_numbers = #tpu.dot_dimension_numbers<[1], [0], [0], [1], [0, 0, 1, 1], [], []>} : vector<128x8xbf16>, vector<8x288xbf16>, vector<128x288xf32> -> vector<128x288xf32>
    %31 = arith.addf %25, %30 : vector<128x288xf32>
    %c0_33 = arith.constant 0 : index
    %c0_34 = arith.constant 0 : index
    %c20 = arith.constant 20 : index
    %32 = vector.load %arg1[%c0_33, %c0_34, %c20] : memref<1x8x326xbf16, #tpu.memory_space<vmem>>, vector<1x8x288xbf16>
    %33 = vector.shape_cast %32 : vector<1x8x288xbf16> to vector<8x288xbf16>
    %c5 = arith.constant 5 : index
    %c0_35 = arith.constant 0 : index
    %c0_36 = arith.constant 0 : index
    %34 = vector.load %arg2[%c5, %c0_35, %c0_36] : memref<9x128x8xbf16, #tpu.memory_space<vmem>>, vector<1x128x8xbf16>
    %35 = vector.shape_cast %34 : vector<1x128x8xbf16> to vector<128x8xbf16>
    %cst_37 = arith.constant dense<0.000000e+00> : vector<128x288xf32>
    %36 = tpu.matmul %35, %33, %cst_37 {dimension_numbers = #tpu.dot_dimension_numbers<[1], [0], [0], [1], [0, 0, 1, 1], [], []>} : vector<128x8xbf16>, vector<8x288xbf16>, vector<128x288xf32> -> vector<128x288xf32>
    %37 = arith.addf %31, %36 : vector<128x288xf32>
    %c0_38 = arith.constant 0 : index
    %c0_39 = arith.constant 0 : index
    %c36 = arith.constant 36 : index
    %38 = vector.load %arg1[%c0_38, %c0_39, %c36] : memref<1x8x326xbf16, #tpu.memory_space<vmem>>, vector<1x8x288xbf16>
    %39 = vector.shape_cast %38 : vector<1x8x288xbf16> to vector<8x288xbf16>
    %c6 = arith.constant 6 : index
    %c0_40 = arith.constant 0 : index
    %c0_41 = arith.constant 0 : index
    %40 = vector.load %arg2[%c6, %c0_40, %c0_41] : memref<9x128x8xbf16, #tpu.memory_space<vmem>>, vector<1x128x8xbf16>
    %41 = vector.shape_cast %40 : vector<1x128x8xbf16> to vector<128x8xbf16>
    %cst_42 = arith.constant dense<0.000000e+00> : vector<128x288xf32>
    %42 = tpu.matmul %41, %39, %cst_42 {dimension_numbers = #tpu.dot_dimension_numbers<[1], [0], [0], [1], [0, 0, 1, 1], [], []>} : vector<128x8xbf16>, vector<8x288xbf16>, vector<128x288xf32> -> vector<128x288xf32>
    %43 = arith.addf %37, %42 : vector<128x288xf32>
    %c0_43 = arith.constant 0 : index
    %c0_44 = arith.constant 0 : index
    %c37 = arith.constant 37 : index
    %44 = vector.load %arg1[%c0_43, %c0_44, %c37] : memref<1x8x326xbf16, #tpu.memory_space<vmem>>, vector<1x8x288xbf16>
    %45 = vector.shape_cast %44 : vector<1x8x288xbf16> to vector<8x288xbf16>
    %c7 = arith.constant 7 : index
    %c0_45 = arith.constant 0 : index
    %c0_46 = arith.constant 0 : index
    %46 = vector.load %arg2[%c7, %c0_45, %c0_46] : memref<9x128x8xbf16, #tpu.memory_space<vmem>>, vector<1x128x8xbf16>
    %47 = vector.shape_cast %46 : vector<1x128x8xbf16> to vector<128x8xbf16>
    %cst_47 = arith.constant dense<0.000000e+00> : vector<128x288xf32>
    %48 = tpu.matmul %47, %45, %cst_47 {dimension_numbers = #tpu.dot_dimension_numbers<[1], [0], [0], [1], [0, 0, 1, 1], [], []>} : vector<128x8xbf16>, vector<8x288xbf16>, vector<128x288xf32> -> vector<128x288xf32>
    %49 = arith.addf %43, %48 : vector<128x288xf32>
    %c0_48 = arith.constant 0 : index
    %c0_49 = arith.constant 0 : index
    %c38 = arith.constant 38 : index
    %50 = vector.load %arg1[%c0_48, %c0_49, %c38] : memref<1x8x326xbf16, #tpu.memory_space<vmem>>, vector<1x8x288xbf16>
    %51 = vector.shape_cast %50 : vector<1x8x288xbf16> to vector<8x288xbf16>
    %c8 = arith.constant 8 : index
    %c0_50 = arith.constant 0 : index
    %c0_51 = arith.constant 0 : index
    %52 = vector.load %arg2[%c8, %c0_50, %c0_51] : memref<9x128x8xbf16, #tpu.memory_space<vmem>>, vector<1x128x8xbf16>
    %53 = vector.shape_cast %52 : vector<1x128x8xbf16> to vector<128x8xbf16>
    %cst_52 = arith.constant dense<0.000000e+00> : vector<128x288xf32>
    %54 = tpu.matmul %53, %51, %cst_52 {dimension_numbers = #tpu.dot_dimension_numbers<[1], [0], [0], [1], [0, 0, 1, 1], [], []>} : vector<128x8xbf16>, vector<8x288xbf16>, vector<128x288xf32> -> vector<128x288xf32>
    %55 = arith.addf %49, %54 : vector<128x288xf32>
    %56 = vector.broadcast %0 : vector<128x1xf32> to vector<128x288xf32>
    %57 = arith.addf %55, %56 : vector<128x288xf32>
    %cst_53 = arith.constant 0.000000e+00 : f32
    %58 = vector.broadcast %cst_53 : f32 to vector<128x288xf32>
    %59 = arith.maximumf %57, %58 : vector<128x288xf32>
    %60 = arith.truncf %59 : vector<128x288xf32> to vector<128x288xbf16>
    %cst_54 = arith.constant dense<0.000000e+00> : vector<1x288xf32>
    %61 = tpu.matmul %1, %60, %cst_54 {dimension_numbers = #tpu.dot_dimension_numbers<[1], [0], [0], [1], [0, 0, 1, 1], [], []>} : vector<1x128xbf16>, vector<128x288xbf16>, vector<1x288xf32> -> vector<1x288xf32>
    %62 = vector.broadcast %2 : vector<1x1xf32> to vector<1x288xf32>
    %63 = arith.addf %61, %62 : vector<1x288xf32>
    %c0_55 = arith.constant 0 : index
    %c0_56 = arith.constant 0 : index
    %c0_57 = arith.constant 0 : index
    %64 = vector.load %arg6[%c0_55, %c0_56, %c0_57] : memref<1x1x288xf32, #tpu.memory_space<vmem>>, vector<1x1x288xf32>
    %65 = vector.shape_cast %64 : vector<1x1x288xf32> to vector<1x288xf32>
    %66 = vector.shape_cast %63 : vector<1x288xf32> to vector<1x1x288xf32>
    tpu.vector_store %arg6[%c0_55, %c0_56, %c0_57], %66 {strides = array<i32>} : memref<1x1x288xf32, #tpu.memory_space<vmem>>, vector<1x1x288xf32>,
    return
  }
  func.func @transform_0(%arg0: i32) -> (i32, i32, i32) {
    %c0_i32 = arith.constant 0 : i32
    %c0_i32_0 = arith.constant 0 : i32
    %c0_i32_1 = arith.constant 0 : i32
    return %arg0, %c0_i32, %c0_i32_0 : i32, i32, i32
  }
  func.func @transform_1(%arg0: i32) -> (i32, i32, i32) {
    %c0_i32 = arith.constant 0 : i32
    %c0_i32_0 = arith.constant 0 : i32
    %c0_i32_1 = arith.constant 0 : i32
    %c0_i32_2 = arith.constant 0 : i32
    return %c0_i32, %c0_i32_0, %c0_i32_1 : i32, i32, i32
  }
  func.func @transform_2(%arg0: i32) -> (i32, i32) {
    %c0_i32 = arith.constant 0 : i32
    %c0_i32_0 = arith.constant 0 : i32
    %c0_i32_1 = arith.constant 0 : i32
    return %c0_i32, %c0_i32_0 : i32, i32
  }
  func.func @transform_3(%arg0: i32) -> (i32, i32) {
    %c0_i32 = arith.constant 0 : i32
    %c0_i32_0 = arith.constant 0 : i32
    %c0_i32_1 = arith.constant 0 : i32
    return %c0_i32, %c0_i32_0 : i32, i32
  }
  func.func @transform_4(%arg0: i32) -> (i32, i32) {
    %c0_i32 = arith.constant 0 : i32
    %c0_i32_0 = arith.constant 0 : i32
    %c0_i32_1 = arith.constant 0 : i32
    return %c0_i32, %c0_i32_0 : i32, i32
  }
  func.func @transform_5(%arg0: i32) -> (i32, i32, i32) {
    %c0_i32 = arith.constant 0 : i32
    %c0_i32_0 = arith.constant 0 : i32
    %c0_i32_1 = arith.constant 0 : i32
    return %arg0, %c0_i32, %c0_i32_0 : i32, i32, i32
  }
}

</mosaic_0001>

<bundles_post_ra>
// kernel: tpu_custom_call.1
= control target key start
LH: loop header
LB: loop body
LE: loop exit
PB: predicated region body
PF: predicated region fallthrough
CT: control target
= control target key end

     0   :  { %s5804_s0 = inlined_call_operand.vmem [shape: bf16[2,8,326], index: 0, kind: input, shape index: {}]   ;;  %s5805_s1 = inlined_call_operand.vmem [shape: bf16[9,128,8], index: 1, kind: input, shape index: {}]   ;;  %s5806_s2 = inlined_call_operand.vmem [shape: f32[128,1], index: 2, kind: input, shape index: {}]   ;;  %s5807_s3 = inlined_call_operand.vmem [shape: bf16[1,128], index: 3, kind: input, shape index: {}]   ;;  %s5808_s4 = inlined_call_operand.<no memory space> [shape: f32[1,1], index: 4, kind: input, shape index: {}]   ;;  %s5809_s5 = inlined_call_operand.hbm [shape: f32[2,1,288], index: 5, kind: output, shape index: {}]  }
   0x1   :  { %v10_v0 = vstv %s5808_s4 }
   0x2   :  { %11 = vst [vmem:[#allocation2] sm:$0x1] %v10_v0 }
   0x3   :  { %12 = vsyncpa [#allocation4], 0 }
   0x4   :  { %14 = vsyncpa [#allocation4 + $0x1], 0  ;;  %s4002_s20 = smov 0   ;;  %s4004_s21 = smov 0  }
   0x5   :  { %s4006_s22 = smov 0   ;;  %s4008_s23 = smov 0  }
   0x6 LB: > { %s4023_s4 = sadd.s32 4294967295, %s3958_s23   ;;  %s3131_s24 = sadd.s32 4294967294, %s3958_s23   ;;  %s3958_s23 = sphi %s4008_s23, %s5960_s23   ;;  %s3954_s22 = sphi %s4006_s22, %s5959_s22   ;;  %s3950_s21 = sphi %s4004_s21, %s5958_s21   ;;  %s3946_s20 = sphi %s4002_s20, %s5957_s20  }
   0x7   : > { %s4027_s25 = sadd.s32 1, %s3958_s23   ;;  %s137_s26 = sadd.s32 1, %s3954_s22 }
   0x8   : > { %s134_s27 = ssub.s32 %s3958_s23, %s4027_s25  ;;  %p147_p0 = scmp.ne.s32.totalorder %s3954_s22, %s3950_s21 }
   0x9   : > { %p135_p1 = scmp.eq.s32.totalorder %s134_s27, 0  ;;  %p148_p2 = scmp.eq.s32.totalorder %s4023_s4, 1 }
   0xa   : > { %p153_p3 = scmp.ne.s32.totalorder %s3950_s21, %s3946_s20  ;;  %p154_p4 = scmp.eq.s32.totalorder %s3131_s24, 1 }
   0xb   : > { %s4038_s28 = scalar_select %p135_p1, %s3954_s22, %s137_s26  }
   0xc   : > { %p4040_p5 = por %p148_p2, %p147_p0  ;;  %p4044_p6 = por %p154_p4, %p153_p3 }
   0xd   : > { %p3134_p7 = scmp.ge.s32.totalorder %s3958_s23, 1  ;;  %p192_p8 = scmp.lt.s32.totalorder %s3958_s23, 3 }
   0xf   : > { %p193_p9 = pnand %p3134_p7, %p192_p8 }
  0x11   : > { %196 = sbr.rel (%p193_p9) target bundleno = 1419 (0x58b), region = 40 }
  0x16   : > { %p220_p10 = scmp.lt.s32.totalorder %s4023_s4, 1  ;;  %s3960_s11 = smov 127   ;;  %vm361_vm0 = vcmask 1043456   ;;  %v4072_v10 = vld [vmem:[%s5805_s1] sm:$0xff]  ;;  %vm336_vm1 = vcmask 64512   ;;  %v4079_v11 = vld [vmem:[%s5805_s1 + $0x8] sm:$0xff] }
  0x17   : > { %s3961_s12 = smov 126   ;;  %v3778_v15 = vld [vmem:[%s5805_s1 + $0x40] sm:$0xff]  ;;  %v4091_v16 = vld [vmem:[%s5805_s1 + $0x10] sm:$0xff]  ;;  %vm333_vm2 = vcmask 1039360   ;;  %s3962_s26 = smov 110   ;;  %v3779_v22 = vld [vmem:[%s5805_s1 + $0x48] sm:$0xff] }
  0x18   : > { %s221_s6 = scalar_select %p220_p10, %s4023_s4, 1  ;;  %v4109_v23 = vld [vmem:[%s5805_s1 + $0x18] sm:$0xff]  ;;  %v3780_v24 = vld [vmem:[%s5805_s1 + $0x50] sm:$0xff]  ;;  %v4122_v25 = vld [vmem:[%s5805_s1 + $0x20] sm:$0xff]  ;;  %vm801_vm3 = vcmask 1031168   ;;  %vm1095_vm4 = vcmask 900096  }
  0x19   : > { %v3781_v26 = vld [vmem:[%s5805_s1 + $0x58] sm:$0xff]  ;;  %v4135_v27 = vld [vmem:[%s5805_s1 + $0x28] sm:$0xff]  ;;  %v3782_v28 = vld [vmem:[%s5805_s1 + $0x60] sm:$0xff]  ;;  %s3963_s16 = smov 109   ;;  %s3964_s19 = smov 108   ;;  %vm1389_vm5 = vcmask 891904  }
  0x1a   : > { %s3843_s7 = smul.u32 12, %s221_s6  ;;  %v4148_v29 = vld [vmem:[%s5805_s1 + $0x30] sm:$0xff]  ;;  %v3783_v31 = vld [vmem:[%s5805_s1 + $0x68] sm:$0xff]  ;;  %v4163_v32 = vld [vmem:[%s5805_s1 + $0x38] sm:$0xff]  ;;  %vm1683_vm6 = vcmask 883712   ;;  %vm1977_vm7 = vcmask 752640  }
  0x1b   : > { %v3784_v40 = vld [vmem:[%s5805_s1 + $0x70] sm:$0xff]  ;;  %v4181_v43 = vld [vmem:[%s5805_s1 + $0x80] sm:$0xff]  ;;  %v3785_v45 = vld [vmem:[%s5805_s1 + $0x78] sm:$0xff]  ;;  %vm2271_vm8 = vcmask 744448   ;;  %vm2565_vm9 = vcmask 736256   ;;  %vm3046_vm10 = vcmask 1040384  }
  0x1c   : > { %s224_s10 = scalar_lea.vmem %s5804_s0, %s3843_s7  ;;  %v4194_v47 = vld [vmem:[%s5805_s1 + $0x88] sm:$0xff]  ;;  %v4210_v51 = vld [vmem:[%s5805_s1 + $0x90] sm:$0xff]  ;;  %v4238_v62 = vld [vmem:[%s5805_s1 + $0x98] sm:$0xff]  ;;  %vm3048_vm11 = vcmask 1041408   ;;  %s3916_s6 = scalar_lea.hbm %s5809_s5, 6 }
  0x1d   : > { %v245_v1 = vld [vmem:[%s224_s10 + $0x8] sm:$0xf]  ;;  %v244_v2 = vld [vmem:[%s224_s10] sm:$0xff]  ;;  %s217_s10 = sand.u32 1, %s3950_s21  }
  0x1e   : > { %v323_v3 = vunpack.c.l.b16 %v245_v1  ;;  %v321_v4 = vunpack.c.l.b16 %v244_v2  ;;  %v322_v5 = vunpack.c.h.b16 %v244_v2 }
  0x20   : > { %v4055_v6 = vpack.c.b16 %v323_v3, %v323_v3  ;;  %v4057_v7 = vpack.c.b16 %v321_v4, %v321_v4  ;;  %v4059_v8 = vpack.c.b16 %v322_v5, %v322_v5 }
  0x22   : > { %331 = vrot.lane.b32.xlu1 %v4055_v6, %s3960_s11  ;;  %327 = vrot.lane.b32.xlu0 %v4057_v7, %s3960_s11  ;;  %v583_v9 = vsel %vm361_vm0, %v4057_v7, 0  ;;  %v586_v30 = vsel %vm361_vm0, %v4059_v8, 0  ;;  %v589_v35 = vsel %vm361_vm0, %v4055_v6, 0 }
  0x23   : > { %797 = vrot.lane.b32.xlu2 %v4059_v8, %s3961_s12  ;;  %598 = vmatpush.bf16.msra.mxu3 %v583_v9 }
  0x26   : > { %3240 = vmatmul.msk.bf16.vlgmr.msra.gmra.mxu3 %vm336_vm1, %v4072_v10 }
  0x2a   : > { %329 = vrot.lane.b32.xlu0 %v4059_v8, %s3960_s11  ;;  %795 = vrot.lane.b32.xlu1 %v4057_v7, %s3961_s12  ;;  %s3842_s11 = smul.u32 3, %s217_s10 }
  0x2b   : > { %799 = vrot.lane.b32.xlu2 %v4055_v6, %s3961_s12  ;;  %s3844_s12 = smul.u32 3, %s4023_s4  ;;  %s3057_s4 = scalar_lea.sflag [#allocation4], %s217_s10 }
  0x2d   : > { %s3067_s15 = scalar_lea.hbm %s5809_s5, %s3844_s12 }
  0x2e   : > { %s3071_s18 = sshll.u32 %s3067_s15, 4  ;;  %s3072_s18 = int_to_ptr.hbm [resolvable:$true] %s3071_s18 }
  0x32   : > { %1091 = vrot.lane.b32.xlu1 %v4059_v8, %s3962_s26  ;;  %1089 = vrot.lane.b32.xlu0 %v4057_v7, %s3962_s26 }
  0x33   : > { %1093 = vrot.lane.b32.xlu2 %v4055_v6, %s3962_s26  ;;  %s3966_s26 = smov 91  }
  0x36   : > { %3241 = vmatmul.msk.bf16.gmra.mxu3 %vm336_vm1, %v4079_v11 }
  0x3a   : > { %1385 = vrot.lane.b32.xlu1 %v4059_v8, %s3963_s16  ;;  %1383 = vrot.lane.b32.xlu0 %v4057_v7, %s3963_s16 }
  0x3b   : > { %1387 = vrot.lane.b32.xlu2 %v4055_v6, %s3963_s16  ;;  %s3967_s16 = smov 90  }
  0x42   : > { %1679 = vrot.lane.b32.xlu0 %v4059_v8, %s3964_s19  ;;  %1681 = vrot.lane.b32.xlu1 %v4055_v6, %s3964_s19 }
  0x43   : > { %1677 = vrot.lane.b32.xlu2 %v4057_v7, %s3964_s19  ;;  %s3965_s19 = smov 92  }
  0x46   : > { %3242 = vmatmul.msk.bf16.gmra.mxu3 %vm336_vm1, %v4091_v16 }
  0x4a   : > { %1973 = vrot.lane.b32.xlu1 %v4059_v8, %s3965_s19  ;;  %1971 = vrot.lane.b32.xlu0 %v4057_v7, %s3965_s19 }
  0x4b   : > { %1975 = vrot.lane.b32.xlu2 %v4055_v6, %s3965_s19  ;;  %s3910_s19 = sshra.s32 %s3072_s18, 4  ;;  %s3911_s19 = int_to_ptr.hbm [resolvable:$true] %s3910_s19 }
  0x4c   : > { %s3912_s24 = scalar_lea.hbm %s3911_s19, 3  ;;  %p3917_p0 = scmp.lt.s32.totalorder %s3911_s19, %s5809_s5 }
  0x4d   : > { %p3913_p11 = scmp.ne.s32.totalorder %s3911_s19, %s3912_s24  ;;  %p3918_p1 = scmp.lt.s32.totalorder %s3916_s6, %s3912_s24 }
  0x4f   : > { %p3914_p12 = pnand %p3913_p11, %p4040_p5  ;;  %p3919_p2 = por %p3918_p1, %p3917_p0 }
  0x51   : > { %p3915_p13 = pneg %p3914_p12 }
  0x52   : > { %2267 = vrot.lane.b32.xlu1 %v4059_v8, %s3966_s26  ;;  %2265 = vrot.lane.b32.xlu0 %v4057_v7, %s3966_s26 }
  0x53   : > { %2269 = vrot.lane.b32.xlu2 %v4055_v6, %s3966_s26  ;;  %p3920_p3 = pnand %p3919_p2, %p3915_p13 }
  0x56   : > { %3243 = vmatmul.msk.bf16.gmra.mxu3 %vm336_vm1, %v4109_v23 }
  0x5a   : > { %2561 = vrot.lane.b32.xlu1 %v4059_v8, %s3967_s16  ;;  %2559 = vrot.lane.b32.xlu0 %v4057_v7, %s3967_s16 }
  0x5b   : > { %2563 = vrot.lane.b32.xlu2 %v4055_v6, %s3967_s16  ;;  %s219_s16 = scalar_lea.vmem [#allocation3], %s3842_s11 }
  0x5c   : > { %s3069_s17 = sshll.u32 %s219_s16, 4  ;;  %s3070_s17 = int_to_ptr.vmem [resolvable:$true] %s3069_s17 }
  0x66   : > { %3244 = vmatmul.msk.bf16.gmra.mxu3 %vm336_vm1, %v4122_v25 }
  0x76   : > { %3245 = vmatmul.msk.bf16.gmra.mxu3 %vm336_vm1, %v4135_v27 }
  0x7d   : > { %v798_v33 = vpop.permute.xlu2 %797 }
  0x85   : > { %v800_v36 = vpop.permute.xlu2 %799 }
  0x86   : > { %3246 = vmatmul.msk.bf16.gmra.mxu3 %vm336_vm1, %v4148_v29  ;;  %v835_v38 = vsel %vm361_vm0, %v800_v36, 0  ;;  %v803_v41 = vsel %vm801_vm3, %v798_v33, %v800_v36 }
  0x87   : > { %v832_v42 = vsel %vm361_vm0, %v803_v41, 0 }
  0x88   : > { %893 = vmatpush.bf16.msrb.mxu3 %v832_v42 }
  0x94   : > { %v332_v12 = vpop.permute.xlu1 %331  ;;  %v328_v13 = vpop.permute.xlu0 %327 }
  0x95   : > { %v369_v14 = vsel %vm361_vm0, %v332_v12, 0 }
  0x96   : > { %476 = vmatpush.bf16.msra.mxu2 %v369_v14  ;;  %3247 = vmatmul.msk.bf16.gmra.mxu3 %vm336_vm1, %v4163_v32 }
  0x99   : > { %3200 = vmatmul.msk.bf16.vlgmr.msra.gmra.mxu2 %vm336_vm1, %v3778_v15 }
  0x9c   : > { %v330_v17 = vpop.permute.xlu0 %329  ;;  %v796_v34 = vpop.permute.xlu1 %795 }
  0x9d   : > { %v334_v18 = vsel %vm333_vm2, %v328_v13, %v330_v17  ;;  %v335_v19 = vsel %vm333_vm2, %v330_v17, %v332_v12  ;;  %v802_v37 = vsel %vm801_vm3, %v796_v34, %v798_v33  ;;  %v4263_v13 = vld [vmem:[%s5805_s1 + $0xa0] sm:$0xff] }
  0x9e   : > { %v363_v20 = vsel %vm361_vm0, %v334_v18, 0  ;;  %v366_v21 = vsel %vm361_vm0, %v335_v19, 0  ;;  %v829_v39 = vsel %vm361_vm0, %v802_v37, 0 }
  0x9f   : > { %378 = vmatpush.bf16.msra.mxu0 %v363_v20  ;;  %427 = vmatpush.bf16.msra.mxu1 %v366_v21 }
  0xa0   : > { %844 = vmatpush.bf16.msrb.mxu2 %v829_v39  ;;  %v4313_v39 = vld [vmem:[%s5805_s1 + $0xb0] sm:$0xff] }
  0xa2   : > { %3184 = vmatmul.msk.bf16.vlgmr.msra.gmra.mxu0 %vm336_vm1, %v3778_v15  ;;  %3192 = vmatmul.msk.bf16.vlgmr.msra.gmra.mxu1 %vm336_vm1, %v3778_v15 }
  0xa3   : > { %647 = vmatpush.bf16.msrb.mxu0 %v586_v30  ;;  %696 = vmatpush.bf16.msrb.mxu1 %v589_v35 }
  0xa6   : > { %3320 = vmatmul.msk.bf16.vlgmr.msrb.gmra.mxu3 %vm336_vm1, %v4181_v43 }
  0xa7   : > { %942 = vmatpush.bf16.msra.mxu0 %v835_v38 }
  0xa9   : > { %3201 = vmatmul.msk.bf16.gmra.mxu2 %vm336_vm1, %v3779_v22  ;;  %v600_v44 = vpop.f32.mrf.mxu3 }
  0xb1   : > { %v602_v46 = vpop.f32.mrf.mxu3 }
  0xb2   : > { %3185 = vmatmul.msk.bf16.gmra.mxu0 %vm336_vm1, %v3779_v22  ;;  %3193 = vmatmul.msk.bf16.gmra.mxu1 %vm336_vm1, %v3779_v22 }
  0xb6   : > { %3321 = vmatmul.msk.bf16.gmra.mxu3 %vm336_vm1, %v4194_v47 }
  0xb9   : > { %3202 = vmatmul.msk.bf16.gmra.mxu2 %vm336_vm1, %v3780_v24  ;;  %v605_v48 = vpop.f32.mrf.mxu3 }
  0xc1   : > { %v607_v49 = vpop.f32.mrf.mxu3 }
  0xc2   : > { %3186 = vmatmul.msk.bf16.gmra.mxu0 %vm336_vm1, %v3780_v24  ;;  %3194 = vmatmul.msk.bf16.gmra.mxu1 %vm336_vm1, %v3780_v24 }
  0xc6   : > { %3322 = vmatmul.msk.bf16.gmra.mxu3 %vm336_vm1, %v4210_v51 }
  0xc9   : > { %3203 = vmatmul.msk.bf16.gmra.mxu2 %vm336_vm1, %v3781_v26  ;;  %v610_v55 = vpop.f32.mrf.mxu3 }
  0xd1   : > { %v612_v60 = vpop.f32.mrf.mxu3 }
  0xd2   : > { %3187 = vmatmul.msk.bf16.gmra.mxu0 %vm336_vm1, %v3781_v26  ;;  %3195 = vmatmul.msk.bf16.gmra.mxu1 %vm336_vm1, %v3781_v26  ;;  %v4288_v26 = vld [vmem:[%s5805_s1 + $0xa8] sm:$0xff] }
  0xd6   : > { %3323 = vmatmul.msk.bf16.gmra.mxu3 %vm336_vm1, %v4238_v62 }
  0xd9   : > { %3204 = vmatmul.msk.bf16.gmra.mxu2 %vm336_vm1, %v3782_v28  ;;  %v615_v2 = vpop.f32.mrf.mxu3 }
  0xe2   : > { %3188 = vmatmul.msk.bf16.gmra.mxu0 %vm336_vm1, %v3782_v28  ;;  %3196 = vmatmul.msk.bf16.gmra.mxu1 %vm336_vm1, %v3782_v28 }
  0xe6   : > { %3324 = vmatmul.msk.bf16.gmra.mxu3 %vm336_vm1, %v4263_v13 }
  0xe9   : > { %3205 = vmatmul.msk.bf16.gmra.mxu2 %vm336_vm1, %v3783_v31 }
  0xf2   : > { %3189 = vmatmul.msk.bf16.gmra.mxu0 %vm336_vm1, %v3783_v31  ;;  %3197 = vmatmul.msk.bf16.gmra.mxu1 %vm336_vm1, %v3783_v31 }
  0xf6   : > { %3325 = vmatmul.msk.bf16.gmra.mxu3 %vm336_vm1, %v4288_v26 }
  0xf9   : > { %3206 = vmatmul.msk.bf16.gmra.mxu2 %vm336_vm1, %v3784_v40 }
 0x102   : > { %3190 = vmatmul.msk.bf16.gmra.mxu0 %vm336_vm1, %v3784_v40  ;;  %3198 = vmatmul.msk.bf16.gmra.mxu1 %vm336_vm1, %v3784_v40 }
 0x106   : > { %3326 = vmatmul.msk.bf16.gmra.mxu3 %vm336_vm1, %v4313_v39 }
 0x109   : > { %3207 = vmatmul.msk.bf16.gmra.mxu2 %vm336_vm1, %v3785_v45 }
 0x112   : > { %3191 = vmatmul.msk.bf16.gmra.mxu0 %vm336_vm1, %v3785_v45  ;;  %3199 = vmatmul.msk.bf16.gmra.mxu1 %vm336_vm1, %v3785_v45 }
 0x119   : > { %3312 = vmatmul.msk.bf16.vlgmr.msrb.gmra.mxu2 %vm336_vm1, %v4181_v43 }
 0x11c   : > { %v4205_v50 = vpop.f32.mrf.mxu2 }
 0x11f   : > { %v380_v52 = vpop.f32.mrf.mxu0  ;;  %v4214_v53 = vpop.f32.mrf.mxu1 }
 0x120   : > { %v4216_v54 = vadd.f32 %v600_v44, %v380_v52 }
 0x122   : > { %3248 = vmatmul.msk.bf16.vlgmr.msrb.gmra.mxu0 %vm336_vm1, %v4072_v10  ;;  %3256 = vmatmul.msk.bf16.vlgmr.msrb.gmra.mxu1 %vm336_vm1, %v4072_v10  ;;  %v617_v10 = vpop.f32.mrf.mxu3 }
 0x124   : > { %v4222_v56 = vpop.f32.mrf.mxu2 }
 0x127   : > { %v382_v57 = vpop.f32.mrf.mxu0  ;;  %v4226_v58 = vpop.f32.mrf.mxu1 }
 0x128   : > { %v4229_v59 = vadd.f32 %v602_v46, %v382_v57 }
 0x129   : > { %3313 = vmatmul.msk.bf16.gmra.mxu2 %vm336_vm1, %v4194_v47 }
 0x12a   : > { %v620_v17 = vpop.f32.mrf.mxu3 }
 0x12c   : > { %v4233_v61 = vpop.f32.mrf.mxu2 }
 0x12f   : > { %v385_v63 = vpop.f32.mrf.mxu0  ;;  %v4242_v0 = vpop.f32.mrf.mxu1 }
 0x130   : > { %v4244_v1 = vadd.f32 %v605_v48, %v385_v63 }
 0x132   : > { %3249 = vmatmul.msk.bf16.gmra.mxu0 %vm336_vm1, %v4079_v11  ;;  %3257 = vmatmul.msk.bf16.gmra.mxu1 %vm336_vm1, %v4079_v11  ;;  %v622_v22 = vpop.f32.mrf.mxu3 }
 0x134   : > { %v4250_v3 = vpop.f32.mrf.mxu2 }
 0x135   : > { %5833 = vst [vmem:[#allocation6_spill] sm:$0xff] %v4250_v3 }
 0x137   : > { %v387_v4 = vpop.f32.mrf.mxu0  ;;  %v4252_v5 = vpop.f32.mrf.mxu1 }
 0x138   : > { %v4254_v9 = vadd.f32 %v607_v49, %v387_v4 }
 0x139   : > { %3314 = vmatmul.msk.bf16.gmra.mxu2 %vm336_vm1, %v4210_v51 }
 0x13a   : > { %v625_v31 = vpop.f32.mrf.mxu3 }
 0x13c   : > { %v4258_v12 = vpop.f32.mrf.mxu2 }
 0x13d   : > { %5834 = vst [vmem:[#allocation7_spill] sm:$0xff] %v4258_v12 }
 0x13f   : > { %v390_v11 = vpop.f32.mrf.mxu0  ;;  %v4267_v14 = vpop.f32.mrf.mxu1 }
 0x140   : > { %v4269_v15 = vadd.f32 %v610_v55, %v390_v11  ;;  %v4338_v55 = vld [vmem:[%s5805_s1 + $0xb8] sm:$0xff]  ;;  %v1090_v11 = vpop.permute.xlu0 %1089 }
 0x141   : > { %3327 = vmatmul.msk.bf16.gmra.mxu3 %vm336_vm1, %v4338_v55 }
 0x142   : > { %3250 = vmatmul.msk.bf16.gmra.mxu0 %vm336_vm1, %v4091_v16  ;;  %3258 = vmatmul.msk.bf16.gmra.mxu1 %vm336_vm1, %v4091_v16  ;;  %v627_v37 = vpop.f32.mrf.mxu3 }
 0x144   : > { %v4275_v18 = vpop.f32.mrf.mxu2 }
 0x145   : > { %5835 = vst [vmem:[#allocation8_spill] sm:$0xff] %v4275_v18 }
 0x147   : > { %v392_v19 = vpop.f32.mrf.mxu0  ;;  %v4277_v20 = vpop.f32.mrf.mxu1 }
 0x148   : > { %v4279_v21 = vadd.f32 %v612_v60, %v392_v19 }
 0x149   : > { %3315 = vmatmul.msk.bf16.gmra.mxu2 %vm336_vm1, %v4238_v62 }
 0x14a   : > { %v630_v42 = vpop.f32.mrf.mxu3 }
 0x14c   : > { %v4283_v24 = vpop.f32.mrf.mxu2 }
 0x14d   : > { %5836 = vst [vmem:[#allocation9_spill] sm:$0xff] %v4283_v24 }
 0x14f   : > { %v395_v16 = vpop.f32.mrf.mxu0  ;;  %v4292_v28 = vpop.f32.mrf.mxu1 }
 0x150   : > { %v4294_v30 = vadd.f32 %v615_v2, %v395_v16  ;;  %v1094_v2 = vpop.permute.xlu2 %1093 }
 0x151   : > { %v1129_v4 = vsel %vm361_vm0, %v1094_v2, 0 }
 0x152   : > { %3251 = vmatmul.msk.bf16.gmra.mxu0 %vm336_vm1, %v4109_v23  ;;  %3259 = vmatmul.msk.bf16.gmra.mxu1 %vm336_vm1, %v4109_v23  ;;  %v632_v49 = vpop.f32.mrf.mxu3 }
 0x153   : > { %1236 = vmatpush.bf16.msra.mxu3 %v1129_v4 }
 0x154   : > { %v4300_v33 = vpop.f32.mrf.mxu2 }
 0x155   : > { %5837 = vst [vmem:[#allocation10_spill] sm:$0xff] %v4300_v33 }
 0x157   : > { %v397_v34 = vpop.f32.mrf.mxu0  ;;  %v4302_v35 = vpop.f32.mrf.mxu1 }
 0x158   : > { %v4304_v36 = vadd.f32 %v617_v10, %v397_v34  ;;  %v1092_v10 = vpop.permute.xlu1 %1091 }
 0x159   : > { %3316 = vmatmul.msk.bf16.gmra.mxu2 %vm336_vm1, %v4263_v13  ;;  %v1096_v19 = vsel %vm1095_vm4, %v1090_v11, %v1092_v10 }
 0x15a   : > { %v635_v63 = vpop.f32.mrf.mxu3  ;;  %v1123_v16 = vsel %vm361_vm0, %v1096_v19, 0 }
 0x15b   : > { %1138 = vmatpush.bf16.msra.mxu1 %v1123_v16 }
 0x15c   : > { %v4308_v38 = vpop.f32.mrf.mxu2 }
 0x15d   : > { %5838 = vst [vmem:[#allocation11_spill] sm:$0xff] %v4308_v38 }
 0x15f   : > { %v400_v23 = vpop.f32.mrf.mxu0  ;;  %v4317_v40 = vpop.f32.mrf.mxu1 }
 0x160   : > { %v4319_v41 = vadd.f32 %v620_v17, %v400_v23  ;;  %v1097_v17 = vsel %vm1095_vm4, %v1092_v10, %v1094_v2  ;;  %v3794_v2 = vld [vmem:[%s5805_s1 + $0xc0] sm:$0xff] }
 0x161   : > { %3400 = vmatmul.msk.bf16.vlgmr.msra.gmra.mxu3 %vm336_vm1, %v3794_v2 }
 0x162   : > { %3252 = vmatmul.msk.bf16.gmra.mxu0 %vm336_vm1, %v4122_v25  ;;  %3260 = vmatmul.msk.bf16.gmra.mxu1 %vm336_vm1, %v4122_v25 }
 0x164   : > { %v4325_v44 = vpop.f32.mrf.mxu2 }
 0x165   : > { %5839 = vst [vmem:[#allocation12_spill] sm:$0xff] %v4325_v44 }
 0x167   : > { %v402_v45 = vpop.f32.mrf.mxu0  ;;  %v4327_v46 = vpop.f32.mrf.mxu1 }
 0x168   : > { %v4329_v48 = vadd.f32 %v622_v22, %v402_v45  ;;  %v1126_v22 = vsel %vm361_vm0, %v1097_v17, 0 }
 0x169   : > { %3317 = vmatmul.msk.bf16.gmra.mxu2 %vm336_vm1, %v4288_v26 }
 0x16a   : > { %1187 = vmatpush.bf16.msra.mxu2 %v1126_v22 }
 0x16c   : > { %v4333_v52 = vpop.f32.mrf.mxu2 }
 0x16d   : > { %5840 = vst [vmem:[#allocation13_spill] sm:$0xff] %v4333_v52 }
 0x16f   : > { %v405_v25 = vpop.f32.mrf.mxu0  ;;  %v4342_v57 = vpop.f32.mrf.mxu1 }
 0x170   : > { %v4344_v60 = vadd.f32 %v625_v31, %v405_v25 }
 0x172   : > { %3253 = vmatmul.msk.bf16.gmra.mxu0 %vm336_vm1, %v4135_v27  ;;  %3261 = vmatmul.msk.bf16.gmra.mxu1 %vm336_vm1, %v4135_v27  ;;  %v637_v27 = vpop.f32.mrf.mxu3 }
 0x174   : > { %v4353_v31 = vpop.f32.mrf.mxu2 }
 0x175   : > { %5841 = vst [vmem:[#allocation14_spill] sm:$0xff] %v4353_v31 }
 0x177   : > { %v407_v34 = vpop.f32.mrf.mxu0  ;;  %v4355_v23 = vpop.f32.mrf.mxu1 }
 0x178   : > { %v4357_v45 = vadd.f32 %v627_v37, %v407_v34 }
 0x179   : > { %3318 = vmatmul.msk.bf16.gmra.mxu2 %vm336_vm1, %v4313_v39 }
 0x17a   : > { %v895_v17 = vpop.f32.mrf.mxu3 }
 0x17c   : > { %v4361_v25 = vpop.f32.mrf.mxu2 }
 0x17d   : > { %5842 = vst [vmem:[#allocation15_spill] sm:$0xff] %v4361_v25 }
 0x17f   : > { %v410_v4 = vpop.f32.mrf.mxu0  ;;  %v4367_v10 = vpop.f32.mrf.mxu1 }
 0x180   : > { %v4369_v11 = vadd.f32 %v630_v42, %v410_v4  ;;  %v3795_v4 = vld [vmem:[%s5805_s1 + $0xc8] sm:$0xff] }
 0x181   : > { %3401 = vmatmul.msk.bf16.gmra.mxu3 %vm336_vm1, %v3795_v4 }
 0x182   : > { %3254 = vmatmul.msk.bf16.gmra.mxu0 %vm336_vm1, %v4148_v29  ;;  %3262 = vmatmul.msk.bf16.gmra.mxu1 %vm336_vm1, %v4148_v29  ;;  %v897_v34 = vpop.f32.mrf.mxu3 }
 0x184   : > { %v4375_v37 = vpop.f32.mrf.mxu2 }
 0x185   : > { %5843 = vst [vmem:[#allocation16_spill] sm:$0xff] %v4375_v37 }
 0x187   : > { %v412_v19 = vpop.f32.mrf.mxu0  ;;  %v4377_v22 = vpop.f32.mrf.mxu1 }
 0x188   : > { %v4379_v16 = vadd.f32 %v632_v49, %v412_v19 }
 0x189   : > { %3319 = vmatmul.msk.bf16.gmra.mxu2 %vm336_vm1, %v4338_v55 }
 0x18a   : > { %v900_v31 = vpop.f32.mrf.mxu3 }
 0x18c   : > { %v4383_v42 = vpop.f32.mrf.mxu2 }
 0x18d   : > { %5844 = vst [vmem:[#allocation17_spill] sm:$0xff] %v4383_v42 }
 0x18f   : > { %v415_v29 = vpop.f32.mrf.mxu0  ;;  %v4389_v25 = vpop.f32.mrf.mxu1 }
 0x190   : > { %v4391_v37 = vadd.f32 %v635_v63, %v415_v29  ;;  %v3796_v63 = vld [vmem:[%s5805_s1 + $0xd0] sm:$0xff] }
 0x191   : > { %3402 = vmatmul.msk.bf16.gmra.mxu3 %vm336_vm1, %v3796_v63 }
 0x192   : > { %3255 = vmatmul.msk.bf16.gmra.mxu0 %vm336_vm1, %v4163_v32  ;;  %3263 = vmatmul.msk.bf16.gmra.mxu1 %vm336_vm1, %v4163_v32  ;;  %v902_v44 = vpop.f32.mrf.mxu3 }
 0x194   : > { %v4397_v49 = vpop.f32.mrf.mxu2 }
 0x195   : > { %5845 = vst [vmem:[#allocation18_spill] sm:$0xff] %v4397_v49 }
 0x197   : > { %v417_v19 = vpop.f32.mrf.mxu0  ;;  %v4399_v42 = vpop.f32.mrf.mxu1 }
 0x198   : > { %v4401_v52 = vadd.f32 %v637_v27, %v417_v19 }
 0x199   : > { %3392 = vmatmul.msk.bf16.vlgmr.msra.gmra.mxu2 %vm336_vm1, %v3794_v2 }
 0x19a   : > { %v905_v27 = vpop.f32.mrf.mxu3 }
 0x19c   : > { %v846_v38 = vpop.f32.mrf.mxu2 }
 0x19d   : > { %v4408_v29 = vadd.f32 %v846_v38, %v4216_v54 }
 0x19f   : > { %v649_v32 = vpop.f32.mrf.mxu0  ;;  %v4411_v49 = vpop.f32.mrf.mxu1 }
 0x1a0   : > { %v650_v33 = vadd.f32 %v649_v32, %v4214_v53 }
 0x1a2   : > { %v4416_v19 = vadd.f32 %v895_v17, %v650_v33  ;;  %3328 = vmatmul.msk.bf16.vlgmr.msra.gmra.mxu0 %vm336_vm1, %v4181_v43  ;;  %3384 = vmatmul.msk.bf16.vlgmr.msra.gmra.mxu1 %vm336_vm1, %v3794_v2  ;;  %v907_v33 = vpop.f32.mrf.mxu3  ;;  %v3797_v43 = vld [vmem:[%s5805_s1 + $0xd8] sm:$0xff] }
 0x1a3   : > { %3403 = vmatmul.msk.bf16.gmra.mxu3 %vm336_vm1, %v3797_v43 }
 0x1a4   : > { %v848_v54 = vpop.f32.mrf.mxu2 }
 0x1a5   : > { %v4423_v38 = vadd.f32 %v848_v54, %v4229_v59 }
 0x1a7   : > { %v651_v53 = vpop.f32.mrf.mxu0  ;;  %v4425_v32 = vpop.f32.mrf.mxu1 }
 0x1a8   : > { %v652_v24 = vadd.f32 %v651_v53, %v4226_v58 }
 0x1a9   : > { %3393 = vmatmul.msk.bf16.gmra.mxu2 %vm336_vm1, %v3795_v4 }
 0x1aa   : > { %v4429_v17 = vadd.f32 %v897_v34, %v652_v24  ;;  %v910_v53 = vpop.f32.mrf.mxu3 }
 0x1ac   : > { %v851_v18 = vpop.f32.mrf.mxu2 }
 0x1ad   : > { %v4435_v2 = vadd.f32 %v851_v18, %v4244_v1 }
 0x1af   : > { %v654_v59 = vpop.f32.mrf.mxu0  ;;  %v4438_v54 = vpop.f32.mrf.mxu1 }
 0x1b0   : > { %v655_v58 = vadd.f32 %v654_v59, %v4242_v0 }
 0x1b2   : > { %v4441_v12 = vadd.f32 %v900_v31, %v655_v58  ;;  %3329 = vmatmul.msk.bf16.gmra.mxu0 %vm336_vm1, %v4194_v47  ;;  %3385 = vmatmul.msk.bf16.gmra.mxu1 %vm336_vm1, %v3795_v4  ;;  %v912_v0 = vpop.f32.mrf.mxu3  ;;  %v3798_v47 = vld [vmem:[%s5805_s1 + $0xe0] sm:$0xff] }
 0x1b3   : > { %3404 = vmatmul.msk.bf16.gmra.mxu3 %vm336_vm1, %v3798_v47 }
 0x1b4   : > { %v853_v24 = vpop.f32.mrf.mxu2 }
 0x1b5   : > { %v4447_v34 = vadd.f32 %v853_v24, %v4254_v9 }
 0x1b7   : > { %v656_v1 = vpop.f32.mrf.mxu0  ;;  %v4449_v18 = vpop.f32.mrf.mxu1 }
 0x1b8   : > { %v657_v3 = vadd.f32 %v656_v1, %v4252_v5 }
 0x1b9   : > { %3394 = vmatmul.msk.bf16.gmra.mxu2 %vm336_vm1, %v3796_v63 }
 0x1ba   : > { %v4453_v59 = vadd.f32 %v902_v44, %v657_v3  ;;  %v915_v24 = vpop.f32.mrf.mxu3 }
 0x1bc   : > { %v856_v31 = vpop.f32.mrf.mxu2 }
 0x1bd   : > { %v4459_v4 = vadd.f32 %v856_v31, %v4269_v15 }
 0x1bf   : > { %5846 = vst [vmem:[#allocation19_spill] sm:$0xff] %v4459_v4  ;;  %v659_v9 = vpop.f32.mrf.mxu0  ;;  %v4462_v58 = vpop.f32.mrf.mxu1 }
 0x1c0   : > { %v660_v5 = vadd.f32 %v659_v9, %v4267_v14 }
 0x1c2   : > { %v4465_v1 = vadd.f32 %v905_v27, %v660_v5  ;;  %3330 = vmatmul.msk.bf16.gmra.mxu0 %vm336_vm1, %v4210_v51  ;;  %3386 = vmatmul.msk.bf16.gmra.mxu1 %vm336_vm1, %v3796_v63  ;;  %v917_v14 = vpop.f32.mrf.mxu3  ;;  %v3799_v51 = vld [vmem:[%s5805_s1 + $0xe8] sm:$0xff] }
 0x1c3   : > { %3405 = vmatmul.msk.bf16.gmra.mxu3 %vm336_vm1, %v3799_v51 }
 0x1c4   : > { %v858_v3 = vpop.f32.mrf.mxu2 }
 0x1c5   : > { %v4471_v44 = vadd.f32 %v858_v3, %v4279_v21 }
 0x1c7   : > { %v661_v15 = vpop.f32.mrf.mxu0  ;;  %v4473_v31 = vpop.f32.mrf.mxu1 }
 0x1c8   : > { %v662_v4 = vadd.f32 %v661_v15, %v4277_v20 }
 0x1c9   : > { %3395 = vmatmul.msk.bf16.gmra.mxu2 %vm336_vm1, %v3797_v43 }
 0x1ca   : > { %v4477_v9 = vadd.f32 %v907_v33, %v662_v4  ;;  %v920_v3 = vpop.f32.mrf.mxu3 }
 0x1cc   : > { %v861_v27 = vpop.f32.mrf.mxu2 }
 0x1cd   : > { %v4483_v63 = vadd.f32 %v861_v27, %v4294_v30 }
 0x1cf   : > { %5847 = vst [vmem:[#allocation20_spill] sm:$0xff] %v4483_v63  ;;  %v664_v21 = vpop.f32.mrf.mxu0  ;;  %v4486_v5 = vpop.f32.mrf.mxu1 }
 0x1d0   : > { %v665_v20 = vadd.f32 %v664_v21, %v4292_v28 }
 0x1d2   : > { %v4489_v15 = vadd.f32 %v910_v53, %v665_v20  ;;  %3331 = vmatmul.msk.bf16.gmra.mxu0 %vm336_vm1, %v4238_v62  ;;  %3387 = vmatmul.msk.bf16.gmra.mxu1 %vm336_vm1, %v3797_v43  ;;  %v922_v28 = vpop.f32.mrf.mxu3  ;;  %v4506_v62 = vld [vmem:[%s5805_s1 + $0xf0] sm:$0xff] }
 0x1d3   : > { %3406 = vmatmul.msk.bf16.gmra.mxu3 %vm336_vm1, %v4506_v62 }
 0x1d4   : > { %v863_v33 = vpop.f32.mrf.mxu2 }
 0x1d5   : > { %v4495_v4 = vadd.f32 %v863_v33, %v4304_v36  ;;  %v1388_v33 = vpop.permute.xlu2 %1387 }
 0x1d7   : > { %5848 = vst [vmem:[#allocation21_spill] sm:$0xff] %v4495_v4  ;;  %v666_v30 = vpop.f32.mrf.mxu0  ;;  %v4497_v27 = vpop.f32.mrf.mxu1 }
 0x1d8   : > { %5849 = vst [vmem:[#allocation22_spill] sm:$0xff] %v4497_v27  ;;  %v667_v63 = vadd.f32 %v666_v30, %v4302_v35  ;;  %v1384_v4 = vpop.permute.xlu0 %1383 }
 0x1d9   : > { %3396 = vmatmul.msk.bf16.gmra.mxu2 %vm336_vm1, %v3798_v47 }
 0x1da   : > { %v4501_v21 = vadd.f32 %v912_v0, %v667_v63  ;;  %v1386_v0 = vpop.permute.xlu1 %1385  ;;  %v1423_v63 = vsel %vm361_vm0, %v1388_v33, 0  ;;  %v925_v27 = vpop.f32.mrf.mxu3 }
 0x1db   : > { %v1391_v30 = vsel %vm1389_vm5, %v1386_v0, %v1388_v33  ;;  %1530 = vmatpush.bf16.msrb.mxu2 %v1423_v63 }
 0x1dc   : > { %5850 = vst [vmem:[#allocation23_spill] sm:$0xff] %v4501_v21  ;;  %v866_v53 = vpop.f32.mrf.mxu2 }
 0x1dd   : > { %v4509_v43 = vadd.f32 %v866_v53, %v4319_v41  ;;  %v1420_v41 = vsel %vm361_vm0, %v1391_v30, 0  ;;  %v1390_v53 = vsel %vm1389_vm5, %v1384_v4, %v1386_v0  ;;  %v3801_v0 = vld [vmem:[%s5805_s1 + $0xf8] sm:$0xff] }
 0x1de   : > { %1481 = vmatpush.bf16.msrb.mxu1 %v1420_v41 }
 0x1df   : > { %5851 = vst [vmem:[#allocation24_spill] sm:$0xff] %v4509_v43  ;;  %v669_v36 = vpop.f32.mrf.mxu0  ;;  %v4513_v20 = vpop.f32.mrf.mxu1 }
 0x1e0   : > { %v670_v35 = vadd.f32 %v669_v36, %v4317_v40  ;;  %v1417_v40 = vsel %vm361_vm0, %v1390_v53, 0 }
 0x1e1   : > { %1432 = vmatpush.bf16.msrb.mxu0 %v1417_v40 }
 0x1e2   : > { %v4517_v21 = vadd.f32 %v915_v24, %v670_v35  ;;  %3332 = vmatmul.msk.bf16.gmra.mxu0 %vm336_vm1, %v4263_v13  ;;  %3388 = vmatmul.msk.bf16.gmra.mxu1 %vm336_vm1, %v3798_v47  ;;  %v927_v13 = vpop.f32.mrf.mxu3 }
 0x1e3   : > { %3407 = vmatmul.msk.bf16.gmra.mxu3 %vm336_vm1, %v3801_v0 }
 0x1e4   : > { %v868_v36 = vpop.f32.mrf.mxu2 }
 0x1e5   : > { %v4525_v33 = vadd.f32 %v868_v36, %v4329_v48 }
 0x1e7   : > { %v671_v43 = vpop.f32.mrf.mxu0  ;;  %v4527_v24 = vpop.f32.mrf.mxu1 }
 0x1e8   : > { %v672_v35 = vadd.f32 %v671_v43, %v4327_v46 }
 0x1e9   : > { %3397 = vmatmul.msk.bf16.gmra.mxu2 %vm336_vm1, %v3799_v51 }
 0x1ea   : > { %v4531_v47 = vadd.f32 %v917_v14, %v672_v35  ;;  %v930_v43 = vpop.f32.mrf.mxu3  ;;  %v1678_v35 = vpop.permute.xlu2 %1677 }
 0x1ec   : > { %v871_v4 = vpop.f32.mrf.mxu2 }
 0x1ed   : > { %v4537_v63 = vadd.f32 %v871_v4, %v4344_v60 }
 0x1ef   : > { %v674_v48 = vpop.f32.mrf.mxu0  ;;  %v4540_v30 = vpop.f32.mrf.mxu1 }
 0x1f0   : > { %v675_v46 = vadd.f32 %v674_v48, %v4342_v57  ;;  %v4554_v57 = vpop.permute.xlu0 %1679 }
 0x1f2   : > { %v4543_v41 = vadd.f32 %v920_v3, %v675_v46  ;;  %3333 = vmatmul.msk.bf16.gmra.mxu0 %vm336_vm1, %v4288_v26  ;;  %3389 = vmatmul.msk.bf16.gmra.mxu1 %vm336_vm1, %v3799_v51  ;;  %v1684_v26 = vsel %vm1683_vm6, %v1678_v35, %v4554_v57  ;;  %v932_v51 = vpop.f32.mrf.mxu3 }
 0x1f4   : > { %v873_v14 = vpop.f32.mrf.mxu2 }
 0x1f5   : > { %v4549_v53 = vadd.f32 %v873_v14, %v4357_v45  ;;  %v1711_v45 = vsel %vm361_vm0, %v1684_v26, 0 }
 0x1f6   : > { %1726 = vmatpush.bf16.msrb.mxu3 %v1711_v45 }
 0x1f7   : > { %v676_v60 = vpop.f32.mrf.mxu0  ;;  %v4551_v40 = vpop.f32.mrf.mxu1 }
 0x1f8   : > { %v677_v36 = vadd.f32 %v676_v60, %v4355_v23  ;;  %v4566_v23 = vld [vmem:[%s5805_s1 + $0x140] sm:$0xff] }
 0x1f9   : > { %3398 = vmatmul.msk.bf16.gmra.mxu2 %vm336_vm1, %v4506_v62  ;;  %3528 = vmatmul.msk.bf16.vlgmr.msrb.gmra.mxu3 %vm336_vm1, %v4566_v23 }
 0x1fa   : > { %v4560_v3 = vadd.f32 %v922_v28, %v677_v36  ;;  %v1238_v60 = vpop.f32.mrf.mxu3 }
 0x1fc   : > { %v876_v4 = vpop.f32.mrf.mxu2 }
 0x1fd   : > { %v4569_v48 = vadd.f32 %v876_v4, %v4369_v11 }
 0x1ff   : > { %v679_v46 = vpop.f32.mrf.mxu0  ;;  %v4573_v14 = vpop.f32.mrf.mxu1 }
 0x200   : > { %v680_v28 = vadd.f32 %v679_v46, %v4367_v10 }
 0x202   : > { %v4576_v36 = vadd.f32 %v925_v27, %v680_v28  ;;  %3334 = vmatmul.msk.bf16.gmra.mxu0 %vm336_vm1, %v4313_v39  ;;  %3390 = vmatmul.msk.bf16.gmra.mxu1 %vm336_vm1, %v4506_v62  ;;  %v1240_v10 = vpop.f32.mrf.mxu3  ;;  %v4594_v39 = vld [vmem:[%s5805_s1 + $0x148] sm:$0xff] }
 0x203   : > { %5852 = vst [vmem:[#allocation25_spill] sm:$0xff] %v4594_v39 }
 0x204   : > { %v878_v35 = vpop.f32.mrf.mxu2 }
 0x205   : > { %v4583_v11 = vadd.f32 %v878_v35, %v4379_v16 }
 0x207   : > { %v681_v26 = vpop.f32.mrf.mxu0  ;;  %v4585_v45 = vpop.f32.mrf.mxu1 }
 0x208   : > { %v682_v4 = vadd.f32 %v681_v26, %v4377_v22 }
 0x209   : > { %3399 = vmatmul.msk.bf16.gmra.mxu2 %vm336_vm1, %v3801_v0  ;;  %3529 = vmatmul.msk.bf16.gmra.mxu3 %vm336_vm1, %v4594_v39 }
 0x20a   : > { %v4589_v27 = vadd.f32 %v927_v13, %v682_v4  ;;  %v1243_v35 = vpop.f32.mrf.mxu3  ;;  %v3802_v4 = vld [vmem:[%s5805_s1 + $0x100] sm:$0xff] }
 0x20c   : > { %v881_v46 = vpop.f32.mrf.mxu2 }
 0x20d   : > { %v4597_v62 = vadd.f32 %v881_v46, %v4391_v37 }
 0x20f   : > { %v684_v16 = vpop.f32.mrf.mxu0  ;;  %v4601_v28 = vpop.f32.mrf.mxu1 }
 0x210   : > { %v685_v22 = vadd.f32 %v684_v16, %v4389_v25 }
 0x212   : > { %v4604_v13 = vadd.f32 %v930_v43, %v685_v22  ;;  %3335 = vmatmul.msk.bf16.gmra.mxu0 %vm336_vm1, %v4338_v55  ;;  %3391 = vmatmul.msk.bf16.gmra.mxu1 %vm336_vm1, %v3801_v0  ;;  %v1245_v43 = vpop.f32.mrf.mxu3  ;;  %v699_v22 = vadd.f32 %v4411_v49, %v4205_v50 }
 0x214   : > { %v883_v26 = vpop.f32.mrf.mxu2 }
 0x215   : > { %v4610_v37 = vadd.f32 %v883_v26, %v4401_v52  ;;  %v4624_v52 = vld [vmem:[%s5805_s1 + $0x150] sm:$0xff] }
 0x216   : > { %5853 = vst [vmem:[#allocation26_spill] sm:$0xff] %v4624_v52 }
 0x217   : > { %v686_v46 = vpop.f32.mrf.mxu0  ;;  %v4615_v39 = vpop.f32.mrf.mxu1 }
 0x218   : > { %v687_v25 = vadd.f32 %v686_v46, %v4399_v42 }
 0x219   : > { %3472 = vmatmul.msk.bf16.vlgmr.msrb.gmra.mxu2 %vm336_vm1, %v3802_v4  ;;  %3530 = vmatmul.msk.bf16.gmra.mxu3 %vm336_vm1, %v4624_v52 }
 0x21a   : > { %v4619_v16 = vadd.f32 %v932_v51, %v687_v25 }
 0x21c   : > { %v1189_v55 = vpop.f32.mrf.mxu2 }
 0x21d   : > { %v4627_v0 = vadd.f32 %v1189_v55, %v4416_v19  ;;  %v1248_v19 = vpop.f32.mrf.mxu3  ;;  %v3803_v55 = vld [vmem:[%s5805_s1 + $0x108] sm:$0xff] }
 0x21f   : > { %v944_v42 = vpop.f32.mrf.mxu0  ;;  %v1140_v51 = vpop.f32.mrf.mxu1 }
 0x220   : > { %v986_v26 = vadd.f32 %v944_v42, %v699_v22  ;;  %v4637_v46 = vadd.f32 %v1140_v51, %v4408_v29  ;;  %v701_v22 = vadd.f32 %v4425_v32, %v4222_v56  ;;  %v704_v56 = vadd.f32 %v4438_v54, %v4233_v61  ;;  %v3804_v61 = vld [vmem:[%s5805_s1 + $0x110] sm:$0xff]  ;;  %v5855_v54 = vld [vmem:[#allocation6_spill] sm:$0xff] }
 0x222   : > { %v4639_v25 = vadd.f32 %v1238_v60, %v986_v26  ;;  %3456 = vmatmul.msk.bf16.vlgmr.msrb.gmra.mxu0 %vm336_vm1, %v3802_v4  ;;  %3464 = vmatmul.msk.bf16.vlgmr.msrb.gmra.mxu1 %vm336_vm1, %v3802_v4 }
 0x224   : > { %v1191_v50 = vpop.f32.mrf.mxu2 }
 0x225   : > { %v4644_v49 = vadd.f32 %v1191_v50, %v4429_v17  ;;  %v1250_v4 = vpop.f32.mrf.mxu3  ;;  %v4660_v50 = vld [vmem:[%s5805_s1 + $0x158] sm:$0xff] }
 0x226   : > { %5854 = vst [vmem:[#allocation27_spill] sm:$0xff] %v4660_v50 }
 0x227   : > { %v946_v29 = vpop.f32.mrf.mxu0  ;;  %v1142_v42 = vpop.f32.mrf.mxu1 }
 0x228   : > { %v989_v51 = vadd.f32 %v946_v29, %v701_v22  ;;  %v4652_v60 = vadd.f32 %v1142_v42, %v4423_v38 }
 0x229   : > { %3473 = vmatmul.msk.bf16.gmra.mxu2 %vm336_vm1, %v3803_v55  ;;  %3531 = vmatmul.msk.bf16.gmra.mxu3 %vm336_vm1, %v4660_v50 }
 0x22a   : > { %v4655_v26 = vadd.f32 %v1240_v10, %v989_v51 }
 0x22c   : > { %v1194_v17 = vpop.f32.mrf.mxu2 }
 0x22d   : > { %v4663_v52 = vadd.f32 %v1194_v17, %v4441_v12  ;;  %v1253_v29 = vpop.f32.mrf.mxu3  ;;  %v706_v17 = vadd.f32 %v4449_v18, %v5855_v54  ;;  %v5857_v18 = vld [vmem:[#allocation7_spill] sm:$0xff] }
 0x22e   : > { %v709_v54 = vadd.f32 %v4462_v58, %v5857_v18  ;;  %v3805_v58 = vld [vmem:[%s5805_s1 + $0x118] sm:$0xff] }
 0x22f   : > { %v949_v38 = vpop.f32.mrf.mxu0  ;;  %v1145_v32 = vpop.f32.mrf.mxu1  ;;  %v5860_v18 = vld [vmem:[#allocation8_spill] sm:$0xff] }
 0x230   : > { %v992_v22 = vadd.f32 %v949_v38, %v704_v56  ;;  %v4670_v10 = vadd.f32 %v1145_v32, %v4435_v2 }
 0x232   : > { %v4672_v42 = vadd.f32 %v1243_v35, %v992_v22  ;;  %3457 = vmatmul.msk.bf16.gmra.mxu0 %vm336_vm1, %v3803_v55  ;;  %3465 = vmatmul.msk.bf16.gmra.mxu1 %vm336_vm1, %v3803_v55  ;;  %v4693_v22 = vld [vmem:[%s5805_s1 + $0x160] sm:$0xff] }
 0x233   : > { %5856 = vst [vmem:[#allocation6_spill] sm:$0xff] %v4693_v22 }
 0x234   : > { %v1196_v12 = vpop.f32.mrf.mxu2 }
 0x235   : > { %v4677_v51 = vadd.f32 %v1196_v12, %v4453_v59  ;;  %v1255_v55 = vpop.f32.mrf.mxu3 }
 0x237   : > { %v951_v2 = vpop.f32.mrf.mxu0  ;;  %v1147_v56 = vpop.f32.mrf.mxu1 }
 0x238   : > { %v995_v38 = vadd.f32 %v951_v2, %v706_v17  ;;  %v4685_v35 = vadd.f32 %v1147_v56, %v4447_v34 }
 0x239   : > { %3474 = vmatmul.msk.bf16.gmra.mxu2 %vm336_vm1, %v3804_v61  ;;  %3532 = vmatmul.msk.bf16.gmra.mxu3 %vm336_vm1, %v4693_v22 }
 0x23a   : > { %v4688_v32 = vadd.f32 %v1245_v43, %v995_v38  ;;  %v5858_v43 = vld [vmem:[#allocation19_spill] sm:$0xff] }
 0x23c   : > { %v1199_v59 = vpop.f32.mrf.mxu2 }
 0x23d   : > { %v4696_v12 = vadd.f32 %v1199_v59, %v4465_v1  ;;  %v1258_v38 = vpop.f32.mrf.mxu3 }
 0x23f   : > { %v954_v34 = vpop.f32.mrf.mxu0  ;;  %v1150_v17 = vpop.f32.mrf.mxu1 }
 0x240   : > { %v998_v2 = vadd.f32 %v954_v34, %v709_v54  ;;  %v4703_v56 = vadd.f32 %v1150_v17, %v5858_v43  ;;  %v711_v54 = vadd.f32 %v4473_v31, %v5860_v18  ;;  %v5863_v31 = vld [vmem:[#allocation9_spill] sm:$0xff] }
 0x241   : > { %v714_v18 = vadd.f32 %v4486_v5, %v5863_v31  ;;  %v3806_v5 = vld [vmem:[%s5805_s1 + $0x120] sm:$0xff] }
 0x242   : > { %v4705_v50 = vadd.f32 %v1248_v19, %v998_v2  ;;  %3458 = vmatmul.msk.bf16.gmra.mxu0 %vm336_vm1, %v3804_v61  ;;  %3466 = vmatmul.msk.bf16.gmra.mxu1 %vm336_vm1, %v3804_v61  ;;  %v5868_v31 = vld [vmem:[#allocation10_spill] sm:$0xff] }
 0x244   : > { %v1201_v1 = vpop.f32.mrf.mxu2 }
 0x245   : > { %v4710_v59 = vadd.f32 %v1201_v1, %v4477_v9  ;;  %v1260_v61 = vpop.f32.mrf.mxu3  ;;  %v4726_v1 = vld [vmem:[%s5805_s1 + $0x168] sm:$0xff] }
 0x246   : > { %5861 = vst [vmem:[#allocation19_spill] sm:$0xff] %v4726_v1 }
 0x247   : > { %5859 = vst [vmem:[#allocation7_spill] sm:$0xff] %v4710_v59  ;;  %v956_v34 = vpop.f32.mrf.mxu0  ;;  %v1152_v17 = vpop.f32.mrf.mxu1 }
 0x248   : > { %v1001_v43 = vadd.f32 %v956_v34, %v711_v54  ;;  %v4718_v19 = vadd.f32 %v1152_v17, %v4471_v44 }
 0x249   : > { %3475 = vmatmul.msk.bf16.gmra.mxu2 %vm336_vm1, %v3805_v58  ;;  %3533 = vmatmul.msk.bf16.gmra.mxu3 %vm336_vm1, %v4726_v1 }
 0x24a   : > { %v4721_v2 = vadd.f32 %v1250_v4, %v1001_v43  ;;  %v5864_v4 = vld [vmem:[#allocation20_spill] sm:$0xff] }
 0x24c   : > { %v1204_v9 = vpop.f32.mrf.mxu2 }
 0x24d   : > { %v4729_v22 = vadd.f32 %v1204_v9, %v4489_v15  ;;  %v1263_v43 = vpop.f32.mrf.mxu3  ;;  %v5866_v9 = vld [vmem:[#allocation23_spill] sm:$0xff] }
 0x24f   : > { %5862 = vst [vmem:[#allocation8_spill] sm:$0xff] %v4729_v22  ;;  %v959_v44 = vpop.f32.mrf.mxu0  ;;  %v1155_v54 = vpop.f32.mrf.mxu1 }
 0x250   : > { %v1004_v34 = vadd.f32 %v959_v44, %v714_v18  ;;  %v4736_v17 = vadd.f32 %v1155_v54, %v5864_v4  ;;  %v5869_v18 = vld [vmem:[#allocation22_spill] sm:$0xff] }
 0x251   : > { %v716_v44 = vadd.f32 %v5869_v18, %v5868_v31  ;;  %v5874_v18 = vld [vmem:[#allocation11_spill] sm:$0xff] }
 0x252   : > { %5865 = vst [vmem:[#allocation9_spill] sm:$0xff] %v4736_v17  ;;  %v4738_v59 = vadd.f32 %v1253_v29, %v1004_v34  ;;  %3459 = vmatmul.msk.bf16.gmra.mxu0 %vm336_vm1, %v3805_v58  ;;  %3467 = vmatmul.msk.bf16.gmra.mxu1 %vm336_vm1, %v3805_v58  ;;  %v5870_v29 = vld [vmem:[#allocation21_spill] sm:$0xff] }
 0x254   : > { %v1206_v15 = vpop.f32.mrf.mxu2 }
 0x255   : > { %v4743_v22 = vadd.f32 %v1206_v15, %v5866_v9  ;;  %v4754_v58 = vpop.f32.mrf.mxu3  ;;  %v4761_v9 = vld [vmem:[%s5805_s1 + $0x170] sm:$0xff] }
 0x256   : > { %5873 = vst [vmem:[#allocation22_spill] sm:$0xff] %v4761_v9 }
 0x257   : > { %5867 = vst [vmem:[#allocation20_spill] sm:$0xff] %v4743_v22  ;;  %v961_v54 = vpop.f32.mrf.mxu0  ;;  %v1157_v4 = vpop.f32.mrf.mxu1 }
 0x258   : > { %v1007_v1 = vadd.f32 %v961_v54, %v716_v44  ;;  %v4751_v34 = vadd.f32 %v1157_v4, %v5870_v29  ;;  %v719_v44 = vadd.f32 %v4513_v20, %v5874_v18  ;;  %v1682_v22 = vpop.permute.xlu1 %1681 }
 0x259   : > { %3476 = vmatmul.msk.bf16.gmra.mxu2 %vm336_vm1, %v3806_v5  ;;  %3534 = vmatmul.msk.bf16.gmra.mxu3 %vm336_vm1, %v4761_v9 }
 0x25a   : > { %5871 = vst [vmem:[#allocation23_spill] sm:$0xff] %v4751_v34  ;;  %v4756_v17 = vadd.f32 %v1255_v55, %v1007_v1  ;;  %v5875_v55 = vld [vmem:[#allocation24_spill] sm:$0xff]  ;;  %v1685_v34 = vsel %vm1683_vm6, %v4554_v57, %v1682_v22  ;;  %v3807_v57 = vld [vmem:[%s5805_s1 + $0x128] sm:$0xff] }
 0x25b   : > { %v1714_v20 = vsel %vm361_vm0, %v1685_v34, 0 }
 0x25c   : > { %5872 = vst [vmem:[#allocation10_spill] sm:$0xff] %v4756_v17  ;;  %v1209_v15 = vpop.f32.mrf.mxu2  ;;  %v1717_v17 = vsel %vm361_vm0, %v1682_v22, 0  ;;  %1775 = vmatpush.bf16.msra.mxu0 %v1714_v20  ;;  %v5876_v22 = vld [vmem:[#allocation12_spill] sm:$0xff] }
 0x25d   : > { %v4764_v31 = vadd.f32 %v1209_v15, %v4517_v21  ;;  %v4776_v21 = vpop.f32.mrf.mxu3  ;;  %1824 = vmatpush.bf16.msra.mxu1 %v1717_v17 }
 0x25f   : > { %v964_v54 = vpop.f32.mrf.mxu0  ;;  %v1160_v4 = vpop.f32.mrf.mxu1 }
 0x260   : > { %v1010_v29 = vadd.f32 %v964_v54, %v719_v44  ;;  %v4771_v1 = vadd.f32 %v1160_v4, %v5875_v55  ;;  %v4800_v55 = vld [vmem:[%s5805_s1 + $0x178] sm:$0xff] }
 0x261   : > { %5877 = vst [vmem:[#allocation21_spill] sm:$0xff] %v4800_v55 }
 0x262   : > { %v4778_v15 = vadd.f32 %v1258_v38, %v1010_v29  ;;  %3460 = vmatmul.msk.bf16.gmra.mxu0 %vm336_vm1, %v3806_v5  ;;  %3468 = vmatmul.msk.bf16.gmra.mxu1 %vm336_vm1, %v3806_v5  ;;  %v721_v38 = vadd.f32 %v4527_v24, %v5876_v22  ;;  %v5878_v24 = vld [vmem:[#allocation13_spill] sm:$0xff] }
 0x264   : > { %v1211_v18 = vpop.f32.mrf.mxu2 }
 0x265   : > { %v4784_v44 = vadd.f32 %v1211_v18, %v4531_v47  ;;  %v1270_v17 = vpop.f32.mrf.mxu3  ;;  %v724_v18 = vadd.f32 %v4540_v30, %v5878_v24  ;;  %v1972_v30 = vpop.permute.xlu0 %1971 }
 0x267   : > { %v966_v54 = vpop.f32.mrf.mxu0  ;;  %v1162_v4 = vpop.f32.mrf.mxu1 }
 0x268   : > { %v1013_v29 = vadd.f32 %v966_v54, %v721_v38  ;;  %v4792_v5 = vadd.f32 %v1162_v4, %v4525_v33 }
 0x269   : > { %3477 = vmatmul.msk.bf16.gmra.mxu2 %vm336_vm1, %v3807_v57  ;;  %3535 = vmatmul.msk.bf16.gmra.mxu3 %vm336_vm1, %v4800_v55 }
 0x26a   : > { %v4795_v34 = vadd.f32 %v1260_v61, %v1013_v29 }
 0x26c   : > { %v1214_v47 = vpop.f32.mrf.mxu2 }
 0x26d   : > { %v4803_v20 = vadd.f32 %v1214_v47, %v4543_v41  ;;  %v4812_v54 = vpop.f32.mrf.mxu3  ;;  %v1974_v41 = vpop.permute.xlu1 %1973 }
 0x26e   : > { %v1978_v29 = vsel %vm1977_vm7, %v1972_v30, %v1974_v41  ;;  %v1976_v30 = vpop.permute.xlu2 %1975 }
 0x26f   : > { %v969_v33 = vpop.f32.mrf.mxu0  ;;  %v1165_v22 = vpop.f32.mrf.mxu1  ;;  %v2005_v24 = vsel %vm361_vm0, %v1978_v29, 0  ;;  %v1979_v29 = vsel %vm1977_vm7, %v1974_v41, %v1976_v30  ;;  %v5880_v41 = vld [vmem:[#allocation15_spill] sm:$0xff] }
 0x270   : > { %v1016_v38 = vadd.f32 %v969_v33, %v724_v18  ;;  %v4810_v61 = vadd.f32 %v1165_v22, %v4537_v63  ;;  %v3808_v63 = vld [vmem:[%s5805_s1 + $0x130] sm:$0xff]  ;;  %2020 = vmatpush.bf16.msra.mxu2 %v2005_v24  ;;  %v2008_v24 = vsel %vm361_vm0, %v1979_v29, 0 }
 0x271   : > { %2069 = vmatpush.bf16.msra.mxu3 %v2008_v24  ;;  %v5881_v24 = vld [vmem:[#allocation16_spill] sm:$0xff] }
 0x272   : > { %v4814_v4 = vadd.f32 %v1263_v43, %v1016_v38  ;;  %3461 = vmatmul.msk.bf16.gmra.mxu0 %vm336_vm1, %v3807_v57  ;;  %3469 = vmatmul.msk.bf16.gmra.mxu1 %vm336_vm1, %v3807_v57  ;;  %v5879_v43 = vld [vmem:[#allocation14_spill] sm:$0xff] }
 0x273   : > { %v726_v33 = vadd.f32 %v4551_v40, %v5879_v43 }
 0x274   : > { %v1216_v47 = vpop.f32.mrf.mxu2 }
 0x275   : > { %v4820_v18 = vadd.f32 %v1216_v47, %v4560_v3  ;;  %v2011_v3 = vsel %vm361_vm0, %v1976_v30, 0  ;;  %v1275_v47 = vpop.f32.mrf.mxu3 }
 0x276   : > { %2118 = vmatpush.bf16.msrb.mxu0 %v2011_v3  ;;  %v3809_v3 = vld [vmem:[%s5805_s1 + $0x138] sm:$0xff] }
 0x277   : > { %v971_v22 = vpop.f32.mrf.mxu0  ;;  %v1167_v57 = vpop.f32.mrf.mxu1 }
 0x278   : > { %v1019_v38 = vadd.f32 %v971_v22, %v726_v33  ;;  %v4828_v55 = vadd.f32 %v1167_v57, %v4549_v53  ;;  %v4839_v53 = vld [vmem:[%s5805_s1 + $0x180] sm:$0xff]  ;;  %v729_v33 = vadd.f32 %v4573_v14, %v5880_v41 }
 0x279   : > { %3478 = vmatmul.msk.bf16.gmra.mxu2 %vm336_vm1, %v3808_v63  ;;  %3608 = vmatmul.msk.bf16.vlgmr.msra.gmra.mxu3 %vm336_vm1, %v4839_v53 }
 0x27a   : > { %v4833_v9 = vadd.f32 %v4754_v58, %v1019_v38 }
 0x27c   : > { %v1219_v40 = vpop.f32.mrf.mxu2 }
 0x27d   : > { %v4842_v43 = vadd.f32 %v1219_v40, %v4576_v36  ;;  %v1728_v30 = vpop.f32.mrf.mxu3 }
 0x27f   : > { %v974_v58 = vpop.f32.mrf.mxu0  ;;  %v1170_v22 = vpop.f32.mrf.mxu1 }
 0x280   : > { %v1022_v57 = vadd.f32 %v974_v58, %v729_v33  ;;  %v4849_v38 = vadd.f32 %v1170_v22, %v4569_v48  ;;  %v731_v48 = vadd.f32 %v4585_v45, %v5881_v24  ;;  %v4873_v22 = vld [vmem:[%s5805_s1 + $0x188] sm:$0xff]  ;;  %v5882_v45 = vld [vmem:[#allocation17_spill] sm:$0xff] }
 0x282   : > { %v4852_v29 = vadd.f32 %v4776_v21, %v1022_v57  ;;  %3462 = vmatmul.msk.bf16.gmra.mxu0 %vm336_vm1, %v3808_v63  ;;  %3470 = vmatmul.msk.bf16.gmra.mxu1 %vm336_vm1, %v3808_v63 }
 0x284   : > { %v1221_v36 = vpop.f32.mrf.mxu2 }
 0x285   : > { %v4857_v14 = vadd.f32 %v1221_v36, %v4589_v27  ;;  %v1730_v63 = vpop.f32.mrf.mxu3  ;;  %v734_v36 = vadd.f32 %v4601_v28, %v5882_v45 }
 0x287   : > { %v976_v40 = vpop.f32.mrf.mxu0  ;;  %v1172_v41 = vpop.f32.mrf.mxu1 }
 0x288   : > { %v1025_v33 = vadd.f32 %v976_v40, %v731_v48  ;;  %v4865_v21 = vadd.f32 %v1172_v41, %v4583_v11  ;;  %v5883_v41 = vld [vmem:[#allocation18_spill] sm:$0xff] }
 0x289   : > { %3479 = vmatmul.msk.bf16.gmra.mxu2 %vm336_vm1, %v3809_v3  ;;  %3609 = vmatmul.msk.bf16.gmra.mxu3 %vm336_vm1, %v4873_v22  ;;  %v736_v7 = vadd.f32 %v4615_v39, %v5883_v41 }
 0x28a   : > { %v4868_v58 = vadd.f32 %v1270_v17, %v1025_v33 }
 0x28c   : > { %v1224_v27 = vpop.f32.mrf.mxu2 }
 0x28d   : > { %v4876_v57 = vadd.f32 %v1224_v27, %v4604_v13  ;;  %v1733_v13 = vpop.f32.mrf.mxu3 }
 0x28f   : > { %v979_v11 = vpop.f32.mrf.mxu0  ;;  %v1175_v17 = vpop.f32.mrf.mxu1 }
 0x290   : > { %v1028_v24 = vadd.f32 %v979_v11, %v734_v36  ;;  %v4886_v48 = vadd.f32 %v1175_v17, %v4597_v62 }
 0x292   : > { %v4889_v40 = vadd.f32 %v4812_v54, %v1028_v24  ;;  %3463 = vmatmul.msk.bf16.gmra.mxu0 %vm336_vm1, %v3809_v3  ;;  %3471 = vmatmul.msk.bf16.gmra.mxu1 %vm336_vm1, %v3809_v3 }
 0x294   : > { %v1226_v28 = vpop.f32.mrf.mxu2 }
 0x295   : > { %v4894_v8 = vadd.f32 %v1226_v28, %v4619_v16  ;;  %v1735_v54 = vpop.f32.mrf.mxu3  ;;  %v4908_v16 = vld [vmem:[%s5805_s1 + $0x190] sm:$0xff] }
 0x297   : > { %v981_v6 = vpop.f32.mrf.mxu0  ;;  %v1177_v33 = vpop.f32.mrf.mxu1 }
 0x298   : > { %v1031_v27 = vadd.f32 %v981_v6, %v736_v7  ;;  %v4899_v62 = vadd.f32 %v1177_v33, %v4610_v37 }
 0x299   : > { %3600 = vmatmul.msk.bf16.vlgmr.msra.gmra.mxu2 %vm336_vm1, %v4839_v53  ;;  %3610 = vmatmul.msk.bf16.gmra.mxu3 %vm336_vm1, %v4908_v16 }
 0x29a   : > { %v4903_v45 = vadd.f32 %v1275_v47, %v1031_v27 }
 0x29c   : > { %v1532_v3 = vpop.f32.mrf.mxu2 }
 0x29d   : > { %v4911_v39 = vadd.f32 %v1532_v3, %v4639_v25  ;;  %v1738_v47 = vpop.f32.mrf.mxu3 }
 0x29f   : > { %v1434_v37 = vpop.f32.mrf.mxu0  ;;  %v1483_v36 = vpop.f32.mrf.mxu1 }
 0x2a0   : > { %v1572_v11 = vadd.f32 %v1434_v37, %v4637_v46  ;;  %v4917_v17 = vadd.f32 %v1483_v36, %v4627_v0  ;;  %v5885_v36 = vld [vmem:[#allocation25_spill] sm:$0xff] }
 0x2a2   : > { %v4919_v24 = vadd.f32 %v1728_v30, %v1572_v11  ;;  %3536 = vmatmul.msk.bf16.vlgmr.msra.gmra.mxu0 %vm336_vm1, %v4566_v23  ;;  %3544 = vmatmul.msk.bf16.vlgmr.msra.gmra.mxu1 %vm336_vm1, %v4566_v23  ;;  %v4939_v23 = vld [vmem:[%s5805_s1 + $0x198] sm:$0xff] }
 0x2a3   : > { %5884 = vst [vmem:[#allocation11_spill] sm:$0xff] %v4939_v23 }
 0x2a4   : > { %v1534_v25 = vpop.f32.mrf.mxu2 }
 0x2a5   : > { %v4926_v28 = vadd.f32 %v1534_v25, %v4655_v26  ;;  %v1740_v30 = vpop.f32.mrf.mxu3 }
 0x2a7   : > { %v1436_v41 = vpop.f32.mrf.mxu0  ;;  %v1485_v7 = vpop.f32.mrf.mxu1 }
 0x2a8   : > { %v1575_v46 = vadd.f32 %v1436_v41, %v4652_v60  ;;  %v4930_v0 = vadd.f32 %v1485_v7, %v4644_v49 }
 0x2a9   : > { %3601 = vmatmul.msk.bf16.gmra.mxu2 %vm336_vm1, %v4873_v22  ;;  %3611 = vmatmul.msk.bf16.gmra.mxu3 %vm336_vm1, %v4939_v23 }
 0x2aa   : > { %v4934_v6 = vadd.f32 %v1730_v63, %v1575_v46 }
 0x2ac   : > { %v1537_v33 = vpop.f32.mrf.mxu2 }
 0x2ad   : > { %v4942_v26 = vadd.f32 %v1537_v33, %v4672_v42  ;;  %v1743_v63 = vpop.f32.mrf.mxu3  ;;  %v4970_v33 = vld [vmem:[%s5805_s1 + $0x1a0] sm:$0xff] }
 0x2ae   : > { %5886 = vst [vmem:[#allocation24_spill] sm:$0xff] %v4970_v33 }
 0x2af   : > { %v1439_v49 = vpop.f32.mrf.mxu0  ;;  %v1488_v60 = vpop.f32.mrf.mxu1 }
 0x2b0   : > { %v1578_v27 = vadd.f32 %v1439_v49, %v4670_v10  ;;  %v4948_v3 = vadd.f32 %v1488_v60, %v4663_v52 }
 0x2b2   : > { %v4950_v37 = vadd.f32 %v1733_v13, %v1578_v27  ;;  %3537 = vmatmul.msk.bf16.gmra.mxu0 %vm336_vm1, %v5885_v36  ;;  %3545 = vmatmul.msk.bf16.gmra.mxu1 %vm336_vm1, %v5885_v36  ;;  %v5887_v36 = vld [vmem:[#allocation26_spill] sm:$0xff] }
 0x2b4   : > { %v1539_v42 = vpop.f32.mrf.mxu2 }
 0x2b5   : > { %v4957_v11 = vadd.f32 %v1539_v42, %v4688_v32  ;;  %v1745_v13 = vpop.f32.mrf.mxu3 }
 0x2b7   : > { %v1441_v25 = vpop.f32.mrf.mxu0  ;;  %v1490_v41 = vpop.f32.mrf.mxu1 }
 0x2b8   : > { %v1581_v10 = vadd.f32 %v1441_v25, %v4685_v35  ;;  %v4961_v52 = vadd.f32 %v1490_v41, %v4677_v51 }
 0x2b9   : > { %3602 = vmatmul.msk.bf16.gmra.mxu2 %vm336_vm1, %v4908_v16  ;;  %3612 = vmatmul.msk.bf16.gmra.mxu3 %vm336_vm1, %v4970_v33 }
 0x2ba   : > { %v4965_v7 = vadd.f32 %v1735_v54, %v1581_v10  ;;  %v5889_v10 = vld [vmem:[#allocation7_spill] sm:$0xff] }
 0x2bc   : > { %v1542_v46 = vpop.f32.mrf.mxu2 }
 0x2bd   : > { %v4973_v32 = vadd.f32 %v1542_v46, %v4705_v50  ;;  %v1748_v54 = vpop.f32.mrf.mxu3 }
 0x2bf   : > { %v1444_v51 = vpop.f32.mrf.mxu0  ;;  %v1493_v35 = vpop.f32.mrf.mxu1 }
 0x2c0   : > { %v1584_v49 = vadd.f32 %v1444_v51, %v4703_v56  ;;  %v4979_v60 = vadd.f32 %v1493_v35, %v4696_v12  ;;  %v5001_v35 = vld [vmem:[%s5805_s1 + $0x1a8] sm:$0xff] }
 0x2c1   : > { %5891 = vst [vmem:[#allocation14_spill] sm:$0xff] %v5001_v35 }
 0x2c2   : > { %v4981_v27 = vadd.f32 %v1738_v47, %v1584_v49  ;;  %3538 = vmatmul.msk.bf16.gmra.mxu0 %vm336_vm1, %v5887_v36  ;;  %3546 = vmatmul.msk.bf16.gmra.mxu1 %vm336_vm1, %v5887_v36  ;;  %v5893_v36 = vld [vmem:[#allocation9_spill] sm:$0xff] }
 0x2c4   : > { %v1544_v50 = vpop.f32.mrf.mxu2 }
 0x2c5   : > { %v4988_v42 = vadd.f32 %v1544_v50, %v4721_v2  ;;  %v1750_v47 = vpop.f32.mrf.mxu3 }
 0x2c7   : > { %5888 = vst [vmem:[#allocation12_spill] sm:$0xff] %v4988_v42  ;;  %v1446_v25 = vpop.f32.mrf.mxu0  ;;  %v1495_v41 = vpop.f32.mrf.mxu1 }
 0x2c8   : > { %v1587_v56 = vadd.f32 %v1446_v25, %v4718_v19  ;;  %v4992_v12 = vadd.f32 %v1495_v41, %v5889_v10  ;;  %v5894_v25 = vld [vmem:[#allocation8_spill] sm:$0xff]  ;;  %v5895_v10 = vld [vmem:[#allocation27_spill] sm:$0xff] }
 0x2c9   : > { %3603 = vmatmul.msk.bf16.gmra.mxu2 %vm336_vm1, %v4939_v23  ;;  %3613 = vmatmul.msk.bf16.gmra.mxu3 %vm336_vm1, %v5001_v35 }
 0x2ca   : > { %5890 = vst [vmem:[#allocation13_spill] sm:$0xff] %v4992_v12  ;;  %v4996_v46 = vadd.f32 %v1740_v30, %v1587_v56  ;;  %v5897_v12 = vld [vmem:[#allocation23_spill] sm:$0xff] }
 0x2cc   : > { %v1547_v51 = vpop.f32.mrf.mxu2 }
 0x2cd   : > { %v5004_v2 = vadd.f32 %v1547_v51, %v4738_v59  ;;  %v1753_v30 = vpop.f32.mrf.mxu3  ;;  %v5896_v51 = vld [vmem:[#allocation10_spill] sm:$0xff] }
 0x2cf   : > { %5892 = vst [vmem:[#allocation15_spill] sm:$0xff] %v5004_v2  ;;  %v1449_v19 = vpop.f32.mrf.mxu0  ;;  %v1498_v49 = vpop.f32.mrf.mxu1 }
 0x2d0   : > { %v1590_v50 = vadd.f32 %v1449_v19, %v5893_v36  ;;  %v5010_v41 = vadd.f32 %v1498_v49, %v5894_v25  ;;  %v5898_v36 = vld [vmem:[#allocation20_spill] sm:$0xff] }
 0x2d2   : > { %v5012_v56 = vadd.f32 %v1743_v63, %v1590_v50  ;;  %3539 = vmatmul.msk.bf16.gmra.mxu0 %vm336_vm1, %v5895_v10  ;;  %3547 = vmatmul.msk.bf16.gmra.mxu1 %vm336_vm1, %v5895_v10  ;;  %v5032_v10 = vld [vmem:[%s5805_s1 + $0x1b0] sm:$0xff] }
 0x2d4   : > { %v1549_v59 = vpop.f32.mrf.mxu2 }
 0x2d5   : > { %v5019_v23 = vadd.f32 %v1549_v59, %v5896_v51  ;;  %v1755_v63 = vpop.f32.mrf.mxu3 }
 0x2d7   : > { %v1451_v2 = vpop.f32.mrf.mxu0  ;;  %v1500_v42 = vpop.f32.mrf.mxu1 }
 0x2d8   : > { %v1593_v19 = vadd.f32 %v1451_v2, %v5897_v12  ;;  %v5023_v49 = vadd.f32 %v1500_v42, %v5898_v36  ;;  %v5900_v36 = vld [vmem:[#allocation6_spill] sm:$0xff] }
 0x2d9   : > { %3604 = vmatmul.msk.bf16.gmra.mxu2 %vm336_vm1, %v4970_v33  ;;  %3614 = vmatmul.msk.bf16.gmra.mxu3 %vm336_vm1, %v5032_v10 }
 0x2da   : > { %v5027_v50 = vadd.f32 %v1745_v13, %v1593_v19 }
 0x2dc   : > { %v1552_v25 = vpop.f32.mrf.mxu2 }
 0x2dd   : > { %v5035_v59 = vadd.f32 %v1552_v25, %v4778_v15  ;;  %v1758_v13 = vpop.f32.mrf.mxu3 }
 0x2df   : > { %5899 = vst [vmem:[#allocation16_spill] sm:$0xff] %v5035_v59  ;;  %v1454_v42 = vpop.f32.mrf.mxu0  ;;  %v1503_v12 = vpop.f32.mrf.mxu1 }
 0x2e0   : > { %v1596_v2 = vadd.f32 %v1454_v42, %v4771_v1  ;;  %v5041_v51 = vadd.f32 %v1503_v12, %v4764_v31 }
 0x2e2   : > { %v5043_v19 = vadd.f32 %v1748_v54, %v1596_v2  ;;  %3540 = vmatmul.msk.bf16.gmra.mxu0 %vm336_vm1, %v5900_v36  ;;  %3548 = vmatmul.msk.bf16.gmra.mxu1 %vm336_vm1, %v5900_v36  ;;  %v5063_v2 = vld [vmem:[%s5805_s1 + $0x1b8] sm:$0xff]  ;;  %v2268_v36 = vpop.permute.xlu1 %2267 }
 0x2e4   : > { %v1554_v15 = vpop.f32.mrf.mxu2 }
 0x2e5   : > { %v5050_v25 = vadd.f32 %v1554_v15, %v4795_v34  ;;  %v1760_v54 = vpop.f32.mrf.mxu3 }
 0x2e7   : > { %5901 = vst [vmem:[#allocation17_spill] sm:$0xff] %v5050_v25  ;;  %v1456_v33 = vpop.f32.mrf.mxu0  ;;  %v1505_v59 = vpop.f32.mrf.mxu1 }
 0x2e8   : > { %v1599_v1 = vadd.f32 %v1456_v33, %v4792_v5  ;;  %v5054_v31 = vadd.f32 %v1505_v59, %v4784_v44 }
 0x2e9   : > { %3605 = vmatmul.msk.bf16.gmra.mxu2 %vm336_vm1, %v5001_v35  ;;  %3615 = vmatmul.msk.bf16.gmra.mxu3 %vm336_vm1, %v5063_v2  ;;  %v2266_v35 = vpop.permute.xlu0 %2265 }
 0x2ea   : > { %v5058_v42 = vadd.f32 %v1750_v47, %v1599_v1  ;;  %v2270_v47 = vpop.permute.xlu2 %2269 }
 0x2eb   : > { %v2305_v15 = vsel %vm361_vm0, %v2270_v47, 0  ;;  %v2273_v1 = vsel %vm2271_vm8, %v2268_v36, %v2270_v47 }
 0x2ec   : > { %v1557_v12 = vpop.f32.mrf.mxu2  ;;  %2412 = vmatpush.bf16.msrb.mxu3 %v2305_v15  ;;  %v3826_v15 = vld [vmem:[%s5805_s1 + $0x1c0] sm:$0xff] }
 0x2ed   : > { %v5066_v34 = vadd.f32 %v1557_v12, %v4814_v4  ;;  %v1763_v25 = vpop.f32.mrf.mxu3  ;;  %v5904_v12 = vld [vmem:[#allocation19_spill] sm:$0xff] }
 0x2ef   : > { %5902 = vst [vmem:[#allocation18_spill] sm:$0xff] %v5066_v34  ;;  %v1459_v44 = vpop.f32.mrf.mxu0  ;;  %v1508_v5 = vpop.f32.mrf.mxu1 }
 0x2f0   : > { %v1602_v33 = vadd.f32 %v1459_v44, %v4810_v61  ;;  %v5072_v59 = vadd.f32 %v1508_v5, %v4803_v20  ;;  %v2302_v61 = vsel %vm361_vm0, %v2273_v1, 0  ;;  %v2272_v20 = vsel %vm2271_vm8, %v2266_v35, %v2268_v36 }
 0x2f1   : > { %v2299_v44 = vsel %vm361_vm0, %v2272_v20, 0  ;;  %2363 = vmatpush.bf16.msrb.mxu2 %v2302_v61 }
 0x2f2   : > { %5903 = vst [vmem:[#allocation25_spill] sm:$0xff] %v5072_v59  ;;  %v5075_v4 = vadd.f32 %v1753_v30, %v1602_v33  ;;  %3541 = vmatmul.msk.bf16.gmra.mxu0 %vm336_vm1, %v5904_v12  ;;  %3549 = vmatmul.msk.bf16.gmra.mxu1 %vm336_vm1, %v5904_v12 }
 0x2f3   : > { %2314 = vmatpush.bf16.msrb.mxu1 %v2299_v44 }
 0x2f4   : > { %v1559_v5 = vpop.f32.mrf.mxu2 }
 0x2f5   : > { %v5084_v47 = vadd.f32 %v1559_v5, %v4833_v9  ;;  %v1765_v35 = vpop.f32.mrf.mxu3 }
 0x2f7   : > { %v1461_v30 = vpop.f32.mrf.mxu0  ;;  %v1510_v33 = vpop.f32.mrf.mxu1 }
 0x2f8   : > { %v1605_v34 = vadd.f32 %v1461_v30, %v4828_v55  ;;  %v5088_v59 = vadd.f32 %v1510_v33, %v4820_v18 }
 0x2f9   : > { %3606 = vmatmul.msk.bf16.gmra.mxu2 %vm336_vm1, %v5032_v10  ;;  %3688 = vmatmul.msk.bf16.vlgmr.msrb.gmra.mxu3 %vm336_vm1, %v3826_v15 }
 0x2fa   : > { %v5092_v36 = vadd.f32 %v1755_v63, %v1605_v34  ;;  %v5905_v34 = vld [vmem:[#allocation22_spill] sm:$0xff] }
 0x2fc   : > { %v1562_v1 = vpop.f32.mrf.mxu2 }
 0x2fd   : > { %v5098_v9 = vadd.f32 %v1562_v1, %v4852_v29  ;;  %v2071_v20 = vpop.f32.mrf.mxu3 }
 0x2ff   : > { %v1464_v55 = vpop.f32.mrf.mxu0  ;;  %v1513_v12 = vpop.f32.mrf.mxu1 }
 0x300   : > { %v1608_v18 = vadd.f32 %v1464_v55, %v4849_v38  ;;  %v5103_v61 = vadd.f32 %v1513_v12, %v4842_v43  ;;  %v3827_v55 = vld [vmem:[%s5805_s1 + $0x1c8] sm:$0xff] }
 0x302   : > { %v5105_v63 = vadd.f32 %v1758_v13, %v1608_v18  ;;  %3542 = vmatmul.msk.bf16.gmra.mxu0 %vm336_vm1, %v5905_v34  ;;  %3550 = vmatmul.msk.bf16.gmra.mxu1 %vm336_vm1, %v5905_v34 }
 0x304   : > { %v1564_v29 = vpop.f32.mrf.mxu2 }
 0x305   : > { %v5112_v44 = vadd.f32 %v1564_v29, %v4868_v58  ;;  %v2073_v13 = vpop.f32.mrf.mxu3  ;;  %v5906_v29 = vld [vmem:[#allocation21_spill] sm:$0xff] }
 0x307   : > { %v1466_v5 = vpop.f32.mrf.mxu0  ;;  %v1515_v30 = vpop.f32.mrf.mxu1 }
 0x308   : > { %v1611_v38 = vadd.f32 %v1466_v5, %v4865_v21  ;;  %v5116_v43 = vadd.f32 %v1515_v30, %v4857_v14 }
 0x309   : > { %3607 = vmatmul.msk.bf16.gmra.mxu2 %vm336_vm1, %v5063_v2  ;;  %3689 = vmatmul.msk.bf16.gmra.mxu3 %vm336_vm1, %v3827_v55 }
 0x30a   : > { %v5120_v33 = vadd.f32 %v1760_v54, %v1611_v38 }
 0x30c   : > { %v1567_v1 = vpop.f32.mrf.mxu2 }
 0x30d   : > { %v5126_v58 = vadd.f32 %v1567_v1, %v4889_v40  ;;  %v2076_v34 = vpop.f32.mrf.mxu3 }
 0x30f   : > { %v1469_v21 = vpop.f32.mrf.mxu0  ;;  %v1518_v12 = vpop.f32.mrf.mxu1 }
 0x310   : > { %v1614_v14 = vadd.f32 %v1469_v21, %v4886_v48  ;;  %v5131_v18 = vadd.f32 %v1518_v12, %v4876_v57  ;;  %v3828_v12 = vld [vmem:[%s5805_s1 + $0x1d0] sm:$0xff] }
 0x312   : > { %v5133_v54 = vadd.f32 %v1763_v25, %v1614_v14  ;;  %3543 = vmatmul.msk.bf16.gmra.mxu0 %vm336_vm1, %v5906_v29  ;;  %3551 = vmatmul.msk.bf16.gmra.mxu1 %vm336_vm1, %v5906_v29 }
 0x314   : > { %v1569_v40 = vpop.f32.mrf.mxu2 }
 0x315   : > { %v5140_v5 = vadd.f32 %v1569_v40, %v4903_v45  ;;  %v2078_v25 = vpop.f32.mrf.mxu3 }
 0x317   : > { %v1471_v30 = vpop.f32.mrf.mxu0  ;;  %v1520_v38 = vpop.f32.mrf.mxu1 }
 0x318   : > { %v1617_v48 = vadd.f32 %v1471_v30, %v4899_v62  ;;  %v5144_v57 = vadd.f32 %v1520_v38, %v4894_v8 }
 0x319   : > { %3680 = vmatmul.msk.bf16.vlgmr.msrb.gmra.mxu2 %vm336_vm1, %v3826_v15  ;;  %3690 = vmatmul.msk.bf16.gmra.mxu3 %vm336_vm1, %v3828_v12 }
 0x31a   : > { %v5147_v1 = vadd.f32 %v1765_v35, %v1617_v48 }
 0x31c   : > { %v2022_v21 = vpop.f32.mrf.mxu2 }
 0x31d   : > { %v5153_v45 = vadd.f32 %v2022_v21, %v4919_v24  ;;  %v2081_v40 = vpop.f32.mrf.mxu3 }
 0x31f   : > { %v1777_v14 = vpop.f32.mrf.mxu0  ;;  %v1826_v62 = vpop.f32.mrf.mxu1 }
 0x320   : > { %v1867_v8 = vadd.f32 %v1777_v14, %v4917_v17  ;;  %v5158_v29 = vadd.f32 %v1826_v62, %v4911_v39 }
 0x322   : > { %v5160_v35 = vadd.f32 %v2071_v20, %v1867_v8  ;;  %3616 = vmatmul.msk.bf16.vlgmr.msrb.gmra.mxu0 %vm336_vm1, %v4839_v53  ;;  %3672 = vmatmul.msk.bf16.vlgmr.msrb.gmra.mxu1 %vm336_vm1, %v3826_v15  ;;  %v3829_v53 = vld [vmem:[%s5805_s1 + $0x1d8] sm:$0xff] }
 0x324   : > { %v2024_v30 = vpop.f32.mrf.mxu2 }
 0x325   : > { %v5166_v24 = vadd.f32 %v2024_v30, %v4934_v6  ;;  %v2083_v39 = vpop.f32.mrf.mxu3 }
 0x327   : > { %v1779_v38 = vpop.f32.mrf.mxu0  ;;  %v1828_v48 = vpop.f32.mrf.mxu1 }
 0x328   : > { %v1870_v21 = vadd.f32 %v1779_v38, %v4930_v0  ;;  %v5170_v17 = vadd.f32 %v1828_v48, %v4926_v28 }
 0x329   : > { %3681 = vmatmul.msk.bf16.gmra.mxu2 %vm336_vm1, %v3827_v55  ;;  %3691 = vmatmul.msk.bf16.gmra.mxu3 %vm336_vm1, %v3829_v53 }
 0x32a   : > { %v5173_v20 = vadd.f32 %v2073_v13, %v1870_v21 }
 0x32c   : > { %v2027_v14 = vpop.f32.mrf.mxu2 }
 0x32d   : > { %v5179_v6 = vadd.f32 %v2027_v14, %v4950_v37  ;;  %v2086_v8 = vpop.f32.mrf.mxu3 }
 0x32f   : > { %v1782_v15 = vpop.f32.mrf.mxu0  ;;  %v1831_v0 = vpop.f32.mrf.mxu1 }
 0x330   : > { %v1873_v28 = vadd.f32 %v1782_v15, %v4948_v3  ;;  %v5184_v62 = vadd.f32 %v1831_v0, %v4942_v26 }
 0x332   : > { %v5186_v13 = vadd.f32 %v2076_v34, %v1873_v28  ;;  %3617 = vmatmul.msk.bf16.gmra.mxu0 %vm336_vm1, %v4873_v22  ;;  %3673 = vmatmul.msk.bf16.gmra.mxu1 %vm336_vm1, %v3827_v55  ;;  %v3830_v22 = vld [vmem:[%s5805_s1 + $0x1e0] sm:$0xff] }
 0x334   : > { %v2029_v30 = vpop.f32.mrf.mxu2 }
 0x335   : > { %v5192_v37 = vadd.f32 %v2029_v30, %v4965_v7  ;;  %v2088_v26 = vpop.f32.mrf.mxu3 }
 0x337   : > { %v1784_v38 = vpop.f32.mrf.mxu0  ;;  %v1833_v48 = vpop.f32.mrf.mxu1 }
 0x338   : > { %v1876_v21 = vadd.f32 %v1784_v38, %v4961_v52  ;;  %v5196_v3 = vadd.f32 %v1833_v48, %v4957_v11  ;;  %v5907_v48 = vld [vmem:[#allocation13_spill] sm:$0xff] }
 0x339   : > { %3682 = vmatmul.msk.bf16.gmra.mxu2 %vm336_vm1, %v3828_v12  ;;  %3692 = vmatmul.msk.bf16.gmra.mxu3 %vm336_vm1, %v3830_v22 }
 0x33a   : > { %v5199_v34 = vadd.f32 %v2078_v25, %v1876_v21 }
 0x33c   : > { %v2032_v14 = vpop.f32.mrf.mxu2 }
 0x33d   : > { %v5205_v7 = vadd.f32 %v2032_v14, %v4981_v27  ;;  %v2091_v0 = vpop.f32.mrf.mxu3 }
 0x33f   : > { %v1787_v55 = vpop.f32.mrf.mxu0  ;;  %v1836_v52 = vpop.f32.mrf.mxu1 }
 0x340   : > { %v1879_v11 = vadd.f32 %v1787_v55, %v4979_v60  ;;  %v5210_v15 = vadd.f32 %v1836_v52, %v4973_v32  ;;  %v5908_v60 = vld [vmem:[#allocation12_spill] sm:$0xff] }
 0x342   : > { %v5212_v25 = vadd.f32 %v2081_v40, %v1879_v11  ;;  %3618 = vmatmul.msk.bf16.gmra.mxu0 %vm336_vm1, %v4908_v16  ;;  %3674 = vmatmul.msk.bf16.gmra.mxu1 %vm336_vm1, %v3828_v12  ;;  %v5232_v12 = vld [vmem:[%s5805_s1 + $0x1e8] sm:$0xff] }
 0x344   : > { %v2034_v28 = vpop.f32.mrf.mxu2 }
 0x345   : > { %v5218_v27 = vadd.f32 %v2034_v28, %v4996_v46  ;;  %v5225_v32 = vpop.f32.mrf.mxu3  ;;  %v5910_v28 = vld [vmem:[#allocation15_spill] sm:$0xff] }
 0x346   : > { %5909 = vst [vmem:[#allocation26_spill] sm:$0xff] %v5225_v32 }
 0x347   : > { %v1789_v30 = vpop.f32.mrf.mxu0  ;;  %v1838_v38 = vpop.f32.mrf.mxu1 }
 0x348   : > { %v1882_v21 = vadd.f32 %v1789_v30, %v5907_v48  ;;  %v5222_v14 = vadd.f32 %v1838_v38, %v5908_v60  ;;  %v5911_v38 = vld [vmem:[#allocation11_spill] sm:$0xff] }
 0x349   : > { %3683 = vmatmul.msk.bf16.gmra.mxu2 %vm336_vm1, %v3829_v53  ;;  %3693 = vmatmul.msk.bf16.gmra.mxu3 %vm336_vm1, %v5232_v12 }
 0x34a   : > { %v5227_v40 = vadd.f32 %v2083_v39, %v1882_v21 }
 0x34c   : > { %v2037_v16 = vpop.f32.mrf.mxu2 }
 0x34d   : > { %v5235_v46 = vadd.f32 %v2037_v16, %v5012_v56  ;;  %v2096_v48 = vpop.f32.mrf.mxu3 }
 0x34f   : > { %v1792_v55 = vpop.f32.mrf.mxu0  ;;  %v1841_v52 = vpop.f32.mrf.mxu1 }
 0x350   : > { %v1885_v11 = vadd.f32 %v1792_v55, %v5010_v41  ;;  %v5241_v30 = vadd.f32 %v1841_v52, %v5910_v28  ;;  %v2564_v28 = vpop.permute.xlu2 %2563 }
 0x352   : > { %v5243_v39 = vadd.f32 %v2086_v8, %v1885_v11  ;;  %3619 = vmatmul.msk.bf16.gmra.mxu0 %vm336_vm1, %v5911_v38  ;;  %3675 = vmatmul.msk.bf16.gmra.mxu1 %vm336_vm1, %v3829_v53  ;;  %v5263_v53 = vld [vmem:[%s5805_s1 + $0x1f0] sm:$0xff]  ;;  %v2562_v38 = vpop.permute.xlu1 %2561 }
 0x354   : > { %v2039_v56 = vpop.f32.mrf.mxu2 }
 0x355   : > { %v5249_v21 = vadd.f32 %v2039_v56, %v5027_v50  ;;  %v5258_v52 = vpop.f32.mrf.mxu3  ;;  %v2599_v56 = vsel %vm361_vm0, %v2564_v28, 0 }
 0x356   : > { %5912 = vst [vmem:[#allocation7_spill] sm:$0xff] %v5258_v52  ;;  %2706 = vmatpush.bf16.msra.mxu2 %v2599_v56  ;;  %v3968_v56 = vmov 0  }
 0x357   : > { %v1794_v60 = vpop.f32.mrf.mxu0  ;;  %v1843_v16 = vpop.f32.mrf.mxu1  ;;  %3894 = vset.pattern.permute.xlu1 %v3968_v56  ;;  %3893 = vset.pattern.permute.xlu0 %v3968_v56 }
 0x358   : > { %v1888_v32 = vadd.f32 %v1794_v60, %v5023_v49  ;;  %v5253_v41 = vadd.f32 %v1843_v16, %v5019_v23  ;;  %v2567_v60 = vsel %vm2565_vm9, %v2562_v38, %v2564_v28  ;;  %v2560_v16 = vpop.permute.xlu0 %2559  ;;  %3895 = vset.pattern.permute.xlu2 %v3968_v56 }
 0x359   : > { %3684 = vmatmul.msk.bf16.gmra.mxu2 %vm336_vm1, %v3830_v22  ;;  %3694 = vmatmul.msk.bf16.gmra.mxu3 %vm336_vm1, %v5263_v53 }
 0x35a   : > { %v5256_v8 = vadd.f32 %v2088_v26, %v1888_v32  ;;  %v5914_v26 = vld [vmem:[#allocation16_spill] sm:$0xff] }
 0x35c   : > { %v2042_v55 = vpop.f32.mrf.mxu2 }
 0x35d   : > { %v5266_v50 = vadd.f32 %v2042_v55, %v5043_v19  ;;  %v5915_v19 = vld [vmem:[#allocation24_spill] sm:$0xff]  ;;  %v2596_v55 = vsel %vm361_vm0, %v2567_v60, 0  ;;  %v2101_v28 = vpop.f32.mrf.mxu3 }
 0x35e   : > { %2657 = vmatpush.bf16.msra.mxu1 %v2596_v55 }
 0x35f   : > { %5913 = vst [vmem:[#allocation9_spill] sm:$0xff] %v5266_v50  ;;  %v1797_v23 = vpop.f32.mrf.mxu0  ;;  %v1846_v49 = vpop.f32.mrf.mxu1 }
 0x360   : > { %v1891_v11 = vadd.f32 %v1797_v23, %v5041_v51  ;;  %v5272_v32 = vadd.f32 %v1846_v49, %v5914_v26  ;;  %v2566_v51 = vsel %vm2565_vm9, %v2560_v16, %v2562_v38  ;;  %v241_v38 = vld [vmem:[%s5806_s2 + $0x78] sm:$0xff] }
 0x361   : > { %v2593_v23 = vsel %vm361_vm0, %v2566_v51, 0  ;;  %2873 = vperm.xlu1 %3894, %v241_v38   ;;  %v5920_v38 = vld [vmem:[#allocation14_spill] sm:$0xff] }
 0x362   : > { %v5275_v52 = vadd.f32 %v2091_v0, %v1891_v11  ;;  %3620 = vmatmul.msk.bf16.gmra.mxu0 %vm336_vm1, %v5915_v19  ;;  %3676 = vmatmul.msk.bf16.gmra.mxu1 %vm336_vm1, %v3830_v22  ;;  %v5917_v19 = vld [vmem:[#allocation17_spill] sm:$0xff] }
 0x363   : > { %2608 = vmatpush.bf16.msra.mxu0 %v2593_v23  ;;  %v5918_v23 = vld [vmem:[#allocation25_spill] sm:$0xff] }
 0x364   : > { %v2044_v49 = vpop.f32.mrf.mxu2 }
 0x365   : > { %v5283_v26 = vadd.f32 %v2044_v49, %v5058_v42  ;;  %v240_v42 = vld [vmem:[%s5806_s2 + $0x70] sm:$0xff] }
 0x366   : > { %2868 = vperm.xlu0 %3893, %v240_v42   ;;  %v237_v42 = vld [vmem:[%s5806_s2 + $0x58] sm:$0xff] }
 0x367   : > { %5916 = vst [vmem:[#allocation8_spill] sm:$0xff] %v5283_v26  ;;  %v1799_v0 = vpop.f32.mrf.mxu0  ;;  %v1848_v11 = vpop.f32.mrf.mxu1 }
 0x368   : > { %v5286_v50 = vadd.f32 %v1799_v0, %v5054_v31  ;;  %v5289_v22 = vadd.f32 %v1848_v11, %v5917_v19  ;;  %v5302_v31 = vld [vmem:[%s5805_s1 + $0x1f8] sm:$0xff]  ;;  %v5919_v0 = vld [vmem:[#allocation18_spill] sm:$0xff]  ;;  %v5313_v19 = vpop.f32.mrf.mxu3 }
 0x369   : > { %3685 = vmatmul.msk.bf16.gmra.mxu2 %vm336_vm1, %v5232_v12  ;;  %3695 = vmatmul.msk.bf16.gmra.mxu3 %vm336_vm1, %v5302_v31 }
 0x36c   : > { %v2047_v60 = vpop.f32.mrf.mxu2 }
 0x36d   : > { %v5305_v16 = vadd.f32 %v2047_v60, %v5075_v4  ;;  %v239_v4 = vld [vmem:[%s5806_s2 + $0x68] sm:$0xff] }
 0x36e   : > { %2863 = vperm.xlu1 %3894, %v239_v4   ;;  %2853 = vperm.xlu0 %3893, %v237_v42  }
 0x36f   : > { %v1802_v55 = vpop.f32.mrf.mxu0  ;;  %v1851_v51 = vpop.f32.mrf.mxu1 }
 0x370   : > { %v1897_v49 = vadd.f32 %v1802_v55, %v5918_v23  ;;  %v5311_v11 = vadd.f32 %v1851_v51, %v5919_v0  ;;  %v2106_v23 = vpop.f32.mrf.mxu3 }
 0x372   : > { %v5315_v26 = vadd.f32 %v2096_v48, %v1897_v49  ;;  %3621 = vmatmul.msk.bf16.gmra.mxu0 %vm336_vm1, %v5920_v38  ;;  %3677 = vmatmul.msk.bf16.gmra.mxu1 %vm336_vm1, %v5232_v12  ;;  %v234_v49 = vld [vmem:[%s5806_s2 + $0x40] sm:$0xff] }
 0x374   : > { %v2049_v56 = vpop.f32.mrf.mxu2 }
 0x375   : > { %v5328_v48 = vadd.f32 %v2049_v56, %v5092_v36  ;;  %v232_v36 = vld [vmem:[%s5806_s2 + $0x30] sm:$0xff] }
 0x376   : > { %2838 = vperm.xlu1 %3894, %v234_v49   ;;  %2828 = vperm.xlu0 %3893, %v232_v36   ;;  %v228_v36 = vld [vmem:[%s5806_s2 + $0x10] sm:$0xff] }
 0x377   : > { %v1804_v60 = vpop.f32.mrf.mxu0  ;;  %v1853_v55 = vpop.f32.mrf.mxu1 }
 0x378   : > { %v5331_v51 = vadd.f32 %v1804_v60, %v5088_v59  ;;  %v5334_v12 = vadd.f32 %v1853_v55, %v5084_v47  ;;  %v231_v60 = vld [vmem:[%s5806_s2 + $0x28] sm:$0xff]  ;;  %v2108_v55 = vpop.f32.mrf.mxu3 }
 0x379   : > { %3686 = vmatmul.msk.bf16.gmra.mxu2 %vm336_vm1, %v5263_v53 }
 0x37c   : > { %v2052_v0 = vpop.f32.mrf.mxu2 }
 0x37d   : > { %v5345_v59 = vadd.f32 %v2052_v0, %v5105_v63  ;;  %v233_v63 = vld [vmem:[%s5806_s2 + $0x38] sm:$0xff] }
 0x37e   : > { %2833 = vperm.xlu1 %3894, %v233_v63   ;;  %2823 = vperm.xlu0 %3893, %v231_v60  }
 0x37f   : > { %v1807_v47 = vpop.f32.mrf.mxu0  ;;  %v1856_v38 = vpop.f32.mrf.mxu1 }
 0x380   : > { %v1903_v4 = vadd.f32 %v1807_v47, %v5103_v61  ;;  %v5349_v42 = vadd.f32 %v1856_v38, %v5098_v9  ;;  %v2414_v47 = vpop.f32.mrf.mxu3 }
 0x382   : > { %v5351_v56 = vadd.f32 %v2101_v28, %v1903_v4  ;;  %3622 = vmatmul.msk.bf16.gmra.mxu0 %vm336_vm1, %v5032_v10  ;;  %3678 = vmatmul.msk.bf16.gmra.mxu1 %vm336_vm1, %v5263_v53 }
 0x384   : > { %v2054_v61 = vpop.f32.mrf.mxu2 }
 0x385   : > { %v5364_v9 = vadd.f32 %v2054_v61, %v5120_v33  ;;  %v226_v33 = vld [vmem:[%s5806_s2] sm:$0xff] }
 0x386   : > { %2808 = vperm.xlu1 %3894, %v228_v36   ;;  %2798 = vperm.xlu0 %3893, %v226_v33  }
 0x387   : > { %v1809_v28 = vpop.f32.mrf.mxu0  ;;  %v1858_v10 = vpop.f32.mrf.mxu1 }
 0x388   : > { %v5367_v49 = vadd.f32 %v1809_v28, %v5116_v43  ;;  %v5370_v53 = vadd.f32 %v1858_v10, %v5112_v44 }
 0x389   : > { %3687 = vmatmul.msk.bf16.gmra.mxu2 %vm336_vm1, %v5302_v31 }
 0x38c   : > { %v2057_v0 = vpop.f32.mrf.mxu2 }
 0x38d   : > { %v5381_v43 = vadd.f32 %v2057_v0, %v5133_v54  ;;  %v227_v54 = vld [vmem:[%s5806_s2 + $0x8] sm:$0xff] }
 0x38e   : > { %2803 = vperm.xlu1 %3894, %v227_v54   ;;  %v236_v54 = vld [vmem:[%s5806_s2 + $0x50] sm:$0xff] }
 0x38f   : > { %v1812_v44 = vpop.f32.mrf.mxu0  ;;  %v1861_v38 = vpop.f32.mrf.mxu1 }
 0x390   : > { %v1909_v4 = vadd.f32 %v1812_v44, %v5131_v18  ;;  %v5385_v63 = vadd.f32 %v1861_v38, %v5126_v58  ;;  %v3834_v58 = vld [vmem:[%s5805_s1 + $0x200] sm:$0xff] }
 0x392   : > { %v5387_v60 = vadd.f32 %v2106_v23, %v1909_v4  ;;  %3623 = vmatmul.msk.bf16.gmra.mxu0 %vm336_vm1, %v5063_v2  ;;  %3679 = vmatmul.msk.bf16.gmra.mxu1 %vm336_vm1, %v5302_v31  ;;  %v2416_v31 = vpop.f32.mrf.mxu3 }
 0x394   : > { %v2059_v61 = vpop.f32.mrf.mxu2 }
 0x395   : > { %v5397_v28 = vadd.f32 %v2059_v61, %v5147_v1  ;;  %v238_v1 = vld [vmem:[%s5806_s2 + $0x60] sm:$0xff] }
 0x396   : > { %2858 = vperm.xlu2 %3895, %v238_v1  }
 0x397   : > { %v1814_v18 = vpop.f32.mrf.mxu0  ;;  %v1863_v23 = vpop.f32.mrf.mxu1 }
 0x398   : > { %v1912_v2 = vadd.f32 %v1814_v18, %v5144_v57  ;;  %v5404_v10 = vadd.f32 %v1863_v23, %v5140_v5 }
 0x399   : > { %3760 = vmatmul.msk.bf16.vlgmr.msra.gmra.mxu2 %vm336_vm1, %v3834_v58 }
 0x39a   : > { %v5407_v36 = vadd.f32 %v2108_v55, %v1912_v2  ;;  %v2419_v55 = vpop.f32.mrf.mxu3 }
 0x39c   : > { %v2365_v33 = vpop.f32.mrf.mxu2 }
 0x39d   : > { %v5413_v0 = vadd.f32 %v2365_v33, %v5160_v35 }
 0x39e   : > { %2848 = vperm.xlu2 %3895, %v236_v54  }
 0x39f   : > { %v2120_v44 = vpop.f32.mrf.mxu0  ;;  %v2316_v38 = vpop.f32.mrf.mxu1 }
 0x3a0   : > { %v2162_v57 = vadd.f32 %v2120_v44, %v5158_v29  ;;  %v5417_v5 = vadd.f32 %v2316_v38, %v5153_v45  ;;  %v3835_v45 = vld [vmem:[%s5805_s1 + $0x208] sm:$0xff] }
 0x3a2   : > { %v5419_v4 = vadd.f32 %v2414_v47, %v2162_v57  ;;  %3744 = vmatmul.msk.bf16.vlgmr.msra.gmra.mxu0 %vm336_vm1, %v3834_v58  ;;  %3752 = vmatmul.msk.bf16.vlgmr.msra.gmra.mxu1 %vm336_vm1, %v3834_v58  ;;  %v2421_v1 = vpop.f32.mrf.mxu3 }
 0x3a4   : > { %v2367_v35 = vpop.f32.mrf.mxu2 }
 0x3a5   : > { %v5427_v61 = vadd.f32 %v2367_v35, %v5173_v20  ;;  %v235_v20 = vld [vmem:[%s5806_s2 + $0x48] sm:$0xff] }
 0x3a6   : > { %2843 = vperm.xlu2 %3895, %v235_v20  }
 0x3a7   : > { %v2122_v29 = vpop.f32.mrf.mxu0  ;;  %v2318_v47 = vpop.f32.mrf.mxu1 }
 0x3a8   : > { %v2165_v18 = vadd.f32 %v2122_v29, %v5170_v17  ;;  %v5434_v58 = vadd.f32 %v2318_v47, %v5166_v24 }
 0x3a9   : > { %3761 = vmatmul.msk.bf16.gmra.mxu2 %vm336_vm1, %v3835_v45 }
 0x3aa   : > { %v5437_v23 = vadd.f32 %v2416_v31, %v2165_v18  ;;  %v230_v31 = vld [vmem:[%s5806_s2 + $0x20] sm:$0xff] }
 0x3ac   : > { %v2370_v2 = vpop.f32.mrf.mxu2 }
 0x3ad   : > { %v5443_v33 = vadd.f32 %v2370_v2, %v5186_v13 }
 0x3ae   : > { %2818 = vperm.xlu2 %3895, %v230_v31  }
 0x3af   : > { %v2125_v44 = vpop.f32.mrf.mxu0  ;;  %v2321_v38 = vpop.f32.mrf.mxu1 }
 0x3b0   : > { %v2168_v17 = vadd.f32 %v2125_v44, %v5184_v62  ;;  %v5447_v24 = vadd.f32 %v2321_v38, %v5179_v6  ;;  %v3836_v6 = vld [vmem:[%s5805_s1 + $0x210] sm:$0xff]  ;;  %v2424_v62 = vpop.f32.mrf.mxu3 }
 0x3b2   : > { %v5449_v57 = vadd.f32 %v2419_v55, %v2168_v17  ;;  %3745 = vmatmul.msk.bf16.gmra.mxu0 %vm336_vm1, %v3835_v45  ;;  %3753 = vmatmul.msk.bf16.gmra.mxu1 %vm336_vm1, %v3835_v45 }
 0x3b4   : > { %v2372_v13 = vpop.f32.mrf.mxu2 }
 0x3b5   : > { %v5457_v54 = vadd.f32 %v2372_v13, %v5199_v34  ;;  %v229_v34 = vld [vmem:[%s5806_s2 + $0x18] sm:$0xff] }
 0x3b6   : > { %2813 = vperm.xlu2 %3895, %v229_v34  }
 0x3b7   : > { %v2127_v55 = vpop.f32.mrf.mxu0  ;;  %v2323_v35 = vpop.f32.mrf.mxu1 }
 0x3b8   : > { %v2171_v29 = vadd.f32 %v2127_v55, %v5196_v3  ;;  %v5464_v45 = vadd.f32 %v2323_v35, %v5192_v37  ;;  %v2426_v38 = vpop.f32.mrf.mxu3 }
 0x3b9   : > { %3762 = vmatmul.msk.bf16.gmra.mxu2 %vm336_vm1, %v3836_v6 }
 0x3ba   : > { %v5467_v47 = vadd.f32 %v2421_v1, %v2171_v29 }
 0x3bc   : > { %v2375_v18 = vpop.f32.mrf.mxu2 }
 0x3bd   : > { %v5473_v20 = vadd.f32 %v2375_v18, %v5212_v25  ;;  %v3837_v25 = vld [vmem:[%s5805_s1 + $0x218] sm:$0xff] }
 0x3bf   : > { %v2130_v2 = vpop.f32.mrf.mxu0  ;;  %v2326_v44 = vpop.f32.mrf.mxu1 }
 0x3c0   : > { %v2174_v3 = vadd.f32 %v2130_v2, %v5210_v15  ;;  %v5477_v37 = vadd.f32 %v2326_v44, %v5205_v7 }
 0x3c2   : > { %v5479_v17 = vadd.f32 %v2424_v62, %v2174_v3  ;;  %3746 = vmatmul.msk.bf16.gmra.mxu0 %vm336_vm1, %v3836_v6  ;;  %3754 = vmatmul.msk.bf16.gmra.mxu1 %vm336_vm1, %v3836_v6  ;;  %v2429_v6 = vpop.f32.mrf.mxu3 }
 0x3c4   : > { %v2377_v1 = vpop.f32.mrf.mxu2 }
 0x3c5   : > { %v5484_v31 = vadd.f32 %v2377_v1, %v5227_v40 }
 0x3c7   : > { %v2132_v13 = vpop.f32.mrf.mxu0  ;;  %v2328_v15 = vpop.f32.mrf.mxu1 }
 0x3c8   : > { %v2177_v7 = vadd.f32 %v2132_v13, %v5222_v14  ;;  %v5491_v55 = vadd.f32 %v2328_v15, %v5218_v27 }
 0x3c9   : > { %3763 = vmatmul.msk.bf16.gmra.mxu2 %vm336_vm1, %v3837_v25 }
 0x3ca   : > { %v5494_v62 = vadd.f32 %v2426_v38, %v2177_v7  ;;  %v2431_v44 = vpop.f32.mrf.mxu3 }
 0x3cc   : > { %v2380_v35 = vpop.f32.mrf.mxu2 }
 0x3cd   : > { %v5497_v40 = vadd.f32 %v2380_v35, %v5243_v39  ;;  %v3838_v39 = vld [vmem:[%s5805_s1 + $0x220] sm:$0xff] }
 0x3cf   : > { %v2135_v29 = vpop.f32.mrf.mxu0  ;;  %v2331_v34 = vpop.f32.mrf.mxu1 }
 0x3d0   : > { %v2180_v18 = vadd.f32 %v2135_v29, %v5241_v30  ;;  %v5501_v2 = vadd.f32 %v2331_v34, %v5235_v46  ;;  %v5921_v29 = vld [vmem:[#allocation9_spill] sm:$0xff] }
 0x3d2   : > { %v5503_v14 = vadd.f32 %v2429_v6, %v2180_v18  ;;  %3747 = vmatmul.msk.bf16.gmra.mxu0 %vm336_vm1, %v3837_v25  ;;  %3755 = vmatmul.msk.bf16.gmra.mxu1 %vm336_vm1, %v3837_v25 }
 0x3d4   : > { %v2382_v27 = vpop.f32.mrf.mxu2 }
 0x3d5   : > { %v5508_v3 = vadd.f32 %v2382_v27, %v5256_v8  ;;  %v2434_v8 = vpop.f32.mrf.mxu3 }
 0x3d7   : > { %v2137_v38 = vpop.f32.mrf.mxu0  ;;  %v2333_v30 = vpop.f32.mrf.mxu1 }
 0x3d8   : > { %v2183_v46 = vadd.f32 %v2137_v38, %v5253_v41  ;;  %v5515_v1 = vadd.f32 %v2333_v30, %v5249_v21  ;;  %v5922_v21 = vld [vmem:[#allocation26_spill] sm:$0xff] }
 0x3d9   : > { %3764 = vmatmul.msk.bf16.gmra.mxu2 %vm336_vm1, %v3838_v39  ;;  %v2188_v18 = vadd.f32 %v5922_v21, %v5286_v50 }
 0x3da   : > { %v5518_v13 = vadd.f32 %v2431_v44, %v2183_v46  ;;  %v3839_v44 = vld [vmem:[%s5805_s1 + $0x228] sm:$0xff]  ;;  %v5923_v46 = vld [vmem:[#allocation8_spill] sm:$0xff] }
 0x3dc   : > { %v2385_v25 = vpop.f32.mrf.mxu2 }
 0x3dd   : > { %v5521_v15 = vadd.f32 %v2385_v25, %v5275_v52 }
 0x3df   : > { %v2140_v7 = vpop.f32.mrf.mxu0  ;;  %v2336_v6 = vpop.f32.mrf.mxu1 }
 0x3e0   : > { %v2186_v35 = vadd.f32 %v2140_v7, %v5272_v32  ;;  %v5525_v34 = vadd.f32 %v2336_v6, %v5921_v29  ;;  %v5925_v29 = vld [vmem:[#allocation7_spill] sm:$0xff] }
 0x3e1   : > { %v2194_v21 = vadd.f32 %v5925_v29, %v5331_v51 }
 0x3e2   : > { %v5527_v41 = vadd.f32 %v2434_v8, %v2186_v35  ;;  %3748 = vmatmul.msk.bf16.gmra.mxu0 %vm336_vm1, %v3838_v39  ;;  %3756 = vmatmul.msk.bf16.gmra.mxu1 %vm336_vm1, %v3838_v39 }
 0x3e4   : > { %v2387_v27 = vpop.f32.mrf.mxu2 }
 0x3e5   : > { %v5533_v52 = vadd.f32 %v2387_v27, %v2188_v18 }
 0x3e7   : > { %v2142_v32 = vpop.f32.mrf.mxu0  ;;  %v2338_v38 = vpop.f32.mrf.mxu1 }
 0x3e8   : > { %v5539_v30 = vadd.f32 %v2142_v32, %v5289_v22  ;;  %v5542_v25 = vadd.f32 %v2338_v38, %v5923_v46  ;;  %v5556_v22 = vpop.permute.xlu1 %2873 }
 0x3e9   : > { %3765 = vmatmul.msk.bf16.gmra.mxu2 %vm336_vm1, %v3839_v44  ;;  %5924 = vst [vmem:[#allocation27_spill] sm:$0xff] %v5556_v22 }
 0x3ec   : > { %v2390_v39 = vpop.f32.mrf.mxu2 }
 0x3ed   : > { %v5546_v50 = vadd.f32 %v2390_v39, %v5315_v26 }
 0x3ef   : > { %v2145_v8 = vpop.f32.mrf.mxu0  ;;  %v2341_v7 = vpop.f32.mrf.mxu1 }
 0x3f0   : > { %v5549_v6 = vadd.f32 %v2145_v8, %v5311_v11  ;;  %v5552_v35 = vadd.f32 %v2341_v7, %v5305_v16  ;;  %v3840_v11 = vld [vmem:[%s5805_s1 + $0x230] sm:$0xff]  ;;  %v5574_v46 = vpop.permute.xlu1 %2863 }
 0x3f1   : > { %5927 = vst [vmem:[#allocation23_spill] sm:$0xff] %v5574_v46 }
 0x3f2   : > { %3749 = vmatmul.msk.bf16.gmra.mxu0 %vm336_vm1, %v3839_v44  ;;  %3757 = vmatmul.msk.bf16.gmra.mxu1 %vm336_vm1, %v3839_v44  ;;  %v5572_v44 = vpop.permute.xlu0 %2868 }
 0x3f3   : > { %5926 = vst [vmem:[#allocation10_spill] sm:$0xff] %v5572_v44 }
 0x3f4   : > { %v2392_v18 = vpop.f32.mrf.mxu2 }
 0x3f5   : > { %v5560_v26 = vadd.f32 %v2392_v18, %v2194_v21 }
 0x3f7   : > { %v2147_v27 = vpop.f32.mrf.mxu0  ;;  %v2343_v32 = vpop.f32.mrf.mxu1 }
 0x3f8   : > { %v5566_v16 = vadd.f32 %v2147_v27, %v5334_v12  ;;  %v5569_v38 = vadd.f32 %v2343_v32, %v5328_v48  ;;  %v2200_v48 = vadd.f32 %v5313_v19, %v5367_v49  ;;  %v5596_v27 = vpop.permute.xlu1 %2838  ;;  %v5605_v49 = vpop.permute.xlu2 %2858 }
 0x3f9   : > { %3766 = vmatmul.msk.bf16.gmra.mxu2 %vm336_vm1, %v3840_v11  ;;  %5934 = vst [vmem:[#allocation12_spill] sm:$0xff] %v5605_v49 }
 0x3fa   : > { %v5589_v18 = vpop.permute.xlu0 %2853 }
 0x3fc   : > { %v2395_v51 = vpop.f32.mrf.mxu2 }
 0x3fd   : > { %v5577_v39 = vadd.f32 %v2395_v51, %v5351_v56 }
 0x3ff   : > { %5928 = vst [vmem:[#allocation20_spill] sm:$0xff] %v5577_v39  ;;  %v2150_v8 = vpop.f32.mrf.mxu0  ;;  %v2346_v7 = vpop.f32.mrf.mxu1 }
 0x400   : > { %v5580_v29 = vadd.f32 %v2150_v8, %v5349_v42  ;;  %v5583_v12 = vadd.f32 %v2346_v7, %v5345_v59  ;;  %v3841_v42 = vld [vmem:[%s5805_s1 + $0x238] sm:$0xff] }
 0x402   : > { %5929 = vst [vmem:[#allocation6_spill] sm:$0xff] %v5580_v29  ;;  %3750 = vmatmul.msk.bf16.gmra.mxu0 %vm336_vm1, %v3840_v11  ;;  %3758 = vmatmul.msk.bf16.gmra.mxu1 %vm336_vm1, %v3840_v11  ;;  %v5610_v7 = vpop.permute.xlu0 %2828 }
 0x403   : > { %5930 = vst [vmem:[#allocation19_spill] sm:$0xff] %v5583_v12 }
 0x404   : > { %v2397_v21 = vpop.f32.mrf.mxu2 }
 0x405   : > { %v5591_v56 = vadd.f32 %v2397_v21, %v2200_v48 }
 0x407   : > { %5931 = vst [vmem:[#allocation22_spill] sm:$0xff] %v5591_v56  ;;  %v2152_v59 = vpop.f32.mrf.mxu0  ;;  %v2348_v32 = vpop.f32.mrf.mxu1 }
 0x408   : > { %v5599_v51 = vadd.f32 %v2152_v59, %v5370_v53  ;;  %v5602_v11 = vadd.f32 %v2348_v32, %v5364_v9  ;;  %v5618_v9 = vpop.permute.xlu1 %2833  ;;  %v5625_v32 = vpop.permute.xlu2 %2848 }
 0x409   : > { %3767 = vmatmul.msk.bf16.gmra.mxu2 %vm336_vm1, %v3841_v42 }
 0x40a   : > { %5932 = vst [vmem:[#allocation21_spill] sm:$0xff] %v5599_v51 }
 0x40b   : > { %5933 = vst [vmem:[#allocation13_spill] sm:$0xff] %v5602_v11 }
 0x40c   : > { %v2400_v19 = vpop.f32.mrf.mxu2 }
 0x40d   : > { %v5608_v8 = vadd.f32 %v2400_v19, %v5387_v60  ;;  %v243_v19 = vld [vmem:[#allocation2] sm:$0x1] }
 0x40e   : > { %2998 = vperm.xlu2 %3895, %v243_v19  }
 0x40f   : > { %5935 = vst [vmem:[#allocation15_spill] sm:$0xff] %v5608_v8  ;;  %v2155_v48 = vpop.f32.mrf.mxu0  ;;  %v2351_v21 = vpop.f32.mrf.mxu1 }
 0x410   : > { %v5613_v22 = vadd.f32 %v2155_v48, %v5385_v63  ;;  %v5616_v53 = vadd.f32 %v2351_v21, %v5381_v43  ;;  %v5627_v63 = vpop.permute.xlu0 %2823  ;;  %v2809_v21 = vpop.permute.xlu1 %2808 }
 0x411   : > { %v5638_v56 = vpop.permute.xlu2 %2843 }
 0x412   : > { %5936 = vst [vmem:[#allocation11_spill] sm:$0xff] %v5613_v22  ;;  %3751 = vmatmul.msk.bf16.gmra.mxu0 %vm336_vm1, %v3841_v42  ;;  %3759 = vmatmul.msk.bf16.gmra.mxu1 %vm336_vm1, %v3841_v42 }
 0x413   : > { %5937 = vst [vmem:[#allocation16_spill] sm:$0xff] %v5616_v53 }
 0x414   : > { %v2402_v59 = vpop.f32.mrf.mxu2 }
 0x415   : > { %v5623_v60 = vadd.f32 %v2402_v59, %v5407_v36 }
 0x417   : > { %5938 = vst [vmem:[#allocation24_spill] sm:$0xff] %v5623_v60  ;;  %v2157_v44 = vpop.f32.mrf.mxu0  ;;  %v2353_v8 = vpop.f32.mrf.mxu1 }
 0x418   : > { %v5630_v43 = vadd.f32 %v2157_v44, %v5404_v10  ;;  %v5633_v48 = vadd.f32 %v2353_v8, %v5397_v28  ;;  %v2799_v19 = vpop.permute.xlu0 %2798  ;;  %v2804_v46 = vpop.permute.xlu1 %2803 }
 0x419   : > { %v2819_v12 = vpop.permute.xlu2 %2818 }
 0x41a   : > { %5939 = vst [vmem:[#allocation17_spill] sm:$0xff] %v5630_v43 }
 0x41b   : > { %5940 = vst [vmem:[#allocation25_spill] sm:$0xff] %v5633_v48 }
 0x41c   : > { %v2708_v42 = vpop.f32.mrf.mxu2 }
 0x41d   : > { %v2750_v53 = vadd.f32 %v2708_v42, %v5419_v4 }
 0x41f   : > { %v2610_v36 = vpop.f32.mrf.mxu0  ;;  %v2659_v59 = vpop.f32.mrf.mxu1  ;;  %v2878_v10 = vadd.f32 %v2799_v19, %v2750_v53 }
 0x420   : > { %v2748_v60 = vadd.f32 %v2610_v36, %v5417_v5  ;;  %v2749_v22 = vadd.f32 %v2659_v59, %v5413_v0 }
 0x421   : > { %v2926_v5 = vmax.f32 %v2878_v10, 0.0  ;;  %v2814_v10 = vpop.permute.xlu2 %2813 }
 0x422   : > { %v2876_v43 = vadd.f32 %v2799_v19, %v2748_v60  ;;  %v2877_v39 = vadd.f32 %v2799_v19, %v2749_v22 }
 0x424   : > { %v2710_v11 = vpop.f32.mrf.mxu2  ;;  %v2924_v49 = vmax.f32 %v2876_v43, 0.0  ;;  %v2925_v53 = vmax.f32 %v2877_v39, 0.0 }
 0x425   : > { %v2753_v44 = vadd.f32 %v2710_v11, %v5437_v23 }
 0x427   : > { %v2881_v28 = vadd.f32 %v2804_v46, %v2753_v44  ;;  %v2612_v8 = vpop.f32.mrf.mxu0  ;;  %v2661_v48 = vpop.f32.mrf.mxu1 }
 0x428   : > { %v2751_v4 = vadd.f32 %v2612_v8, %v5434_v58  ;;  %v2752_v42 = vadd.f32 %v2661_v48, %v5427_v61 }
 0x429   : > { %v2929_v36 = vmax.f32 %v2881_v28, 0.0 }
 0x42a   : > { %v2879_v0 = vadd.f32 %v2804_v46, %v2751_v4  ;;  %v2880_v59 = vadd.f32 %v2804_v46, %v2752_v42 }
 0x42b   : > { %v5643_v51 = vpack.c.bf16 %v2929_v36, %v2926_v5 }
 0x42c   : > { %v2927_v29 = vmax.f32 %v2879_v0, 0.0  ;;  %v2928_v23 = vmax.f32 %v2880_v59, 0.0  ;;  %v2713_v11 = vpop.f32.mrf.mxu2 }
 0x42d   : > { %v2756_v44 = vadd.f32 %v2713_v11, %v5449_v57 }
 0x42e   : > { %v5646_v60 = vpack.c.bf16 %v2927_v29, %v2924_v49  ;;  %v5648_v22 = vpack.c.bf16 %v2928_v23, %v2925_v53 }
 0x42f   : > { %v2615_v58 = vpop.f32.mrf.mxu0  ;;  %v2664_v61 = vpop.f32.mrf.mxu1  ;;  %v2884_v28 = vadd.f32 %v2809_v21, %v2756_v44 }
 0x430   : > { %v2754_v48 = vadd.f32 %v2615_v58, %v5447_v24  ;;  %v2755_v46 = vadd.f32 %v2664_v61, %v5443_v33 }
 0x431   : > { %v2932_v5 = vmax.f32 %v2884_v28, 0.0 }
 0x432   : > { %v2882_v42 = vadd.f32 %v2809_v21, %v2754_v48  ;;  %v2883_v57 = vadd.f32 %v2809_v21, %v2755_v46 }
 0x434   : > { %v2715_v19 = vpop.f32.mrf.mxu2  ;;  %v2930_v33 = vmax.f32 %v2882_v42, 0.0  ;;  %v2931_v53 = vmax.f32 %v2883_v57, 0.0 }
 0x435   : > { %v2759_v39 = vadd.f32 %v2715_v19, %v5467_v47 }
 0x437   : > { %v2887_v43 = vadd.f32 %v2814_v10, %v2759_v39  ;;  %v2617_v8 = vpop.f32.mrf.mxu0  ;;  %v2666_v4 = vpop.f32.mrf.mxu1 }
 0x438   : > { %v2757_v29 = vadd.f32 %v2617_v8, %v5464_v45  ;;  %v2758_v49 = vadd.f32 %v2666_v4, %v5457_v54 }
 0x439   : > { %v2935_v36 = vmax.f32 %v2887_v43, 0.0 }
 0x43a   : > { %v2885_v0 = vadd.f32 %v2814_v10, %v2757_v29  ;;  %v2886_v24 = vadd.f32 %v2814_v10, %v2758_v49 }
 0x43b   : > { %v5655_v59 = vpack.c.bf16 %v2935_v36, %v2932_v5 }
 0x43c   : > { %v2933_v23 = vmax.f32 %v2885_v0, 0.0  ;;  %v2934_v11 = vmax.f32 %v2886_v24, 0.0  ;;  %v2718_v47 = vpop.f32.mrf.mxu2 }
 0x43d   : > { %v2762_v44 = vadd.f32 %v2718_v47, %v5479_v17 }
 0x43e   : > { %v5658_v58 = vpack.c.bf16 %v2933_v23, %v2930_v33  ;;  %v5660_v21 = vpack.c.bf16 %v2934_v11, %v2931_v53 }
 0x43f   : > { %v2620_v45 = vpop.f32.mrf.mxu0  ;;  %v2669_v61 = vpop.f32.mrf.mxu1  ;;  %v2890_v19 = vadd.f32 %v2819_v12, %v2762_v44 }
 0x440   : > { %v2760_v54 = vadd.f32 %v2620_v45, %v5477_v37  ;;  %v2761_v48 = vadd.f32 %v2669_v61, %v5473_v20 }
 0x441   : > { %v2938_v57 = vmax.f32 %v2890_v19, 0.0 }
 0x442   : > { %v2888_v8 = vadd.f32 %v2819_v12, %v2760_v54  ;;  %v2889_v17 = vadd.f32 %v2819_v12, %v2761_v48 }
 0x444   : > { %v2720_v46 = vpop.f32.mrf.mxu2  ;;  %v2936_v5 = vmax.f32 %v2888_v8, 0.0 }
 0x445   : > { %v2765_v10 = vadd.f32 %v2720_v46, %v5494_v62  ;;  %v2937_v62 = vmax.f32 %v2889_v17, 0.0 }
 0x447   : > { %v2893_v28 = vadd.f32 %v5627_v63, %v2765_v10  ;;  %v2622_v39 = vpop.f32.mrf.mxu0  ;;  %v2671_v43 = vpop.f32.mrf.mxu1 }
 0x448   : > { %v2763_v4 = vadd.f32 %v2622_v39, %v5491_v55  ;;  %v2764_v42 = vadd.f32 %v2671_v43, %v5484_v31 }
 0x449   : > { %v2941_v29 = vmax.f32 %v2893_v28, 0.0 }
 0x44a   : > { %v2891_v37 = vadd.f32 %v5627_v63, %v2763_v4  ;;  %v2892_v20 = vadd.f32 %v5627_v63, %v2764_v42  ;;  %v2436_v63 = vpop.f32.mrf.mxu3 }
 0x44b   : > { %v5670_v49 = vpack.c.bf16 %v2941_v29, %v2938_v57 }
 0x44c   : > { %v2939_v36 = vmax.f32 %v2891_v37, 0.0  ;;  %v2940_v0 = vmax.f32 %v2892_v20, 0.0  ;;  %v2723_v24 = vpop.f32.mrf.mxu2 }
 0x44d   : > { %v2768_v33 = vadd.f32 %v2723_v24, %v5503_v14 }
 0x44e   : > { %v5673_v12 = vpack.c.bf16 %v2939_v36, %v2936_v5  ;;  %v5675_v55 = vpack.c.bf16 %v2940_v0, %v2937_v62  ;;  %v2483_v62 = vadd.f32 %v2436_v63, %v5539_v30 }
 0x44f   : > { %v2625_v31 = vpop.f32.mrf.mxu0  ;;  %v2674_v53 = vpop.f32.mrf.mxu1  ;;  %v2896_v44 = vadd.f32 %v5610_v7, %v2768_v33 }
 0x450   : > { %v2766_v23 = vadd.f32 %v2625_v31, %v5501_v2  ;;  %v2767_v11 = vadd.f32 %v2674_v53, %v5497_v40 }
 0x451   : > { %v2944_v10 = vmax.f32 %v2896_v44, 0.0 }
 0x452   : > { %v2894_v48 = vadd.f32 %v5610_v7, %v2766_v23  ;;  %v2895_v46 = vadd.f32 %v5610_v7, %v2767_v11  ;;  %v2439_v7 = vpop.f32.mrf.mxu3 }
 0x453   : > { %v2486_v63 = vadd.f32 %v2439_v7, %v5549_v6 }
 0x454   : > { %v2725_v47 = vpop.f32.mrf.mxu2  ;;  %v2943_v8 = vmax.f32 %v2895_v46, 0.0 }
 0x455   : > { %v2771_v45 = vadd.f32 %v2725_v47, %v5518_v13  ;;  %v2942_v13 = vmax.f32 %v2894_v48, 0.0 }
 0x457   : > { %v2899_v61 = vadd.f32 %v5618_v9, %v2771_v45  ;;  %v2627_v54 = vpop.f32.mrf.mxu0  ;;  %v2676_v14 = vpop.f32.mrf.mxu1 }
 0x458   : > { %v2769_v19 = vadd.f32 %v2627_v54, %v5515_v1  ;;  %v2770_v2 = vadd.f32 %v2676_v14, %v5508_v3 }
 0x459   : > { %v2947_v40 = vmax.f32 %v2899_v61, 0.0 }
 0x45a   : > { %v2897_v28 = vadd.f32 %v5618_v9, %v2769_v19  ;;  %v2898_v39 = vadd.f32 %v5618_v9, %v2770_v2  ;;  %v2441_v31 = vpop.f32.mrf.mxu3 }
 0x45b   : > { %v5688_v43 = vpack.c.bf16 %v2947_v40, %v2944_v10 }
 0x45c   : > { %v2945_v17 = vmax.f32 %v2897_v28, 0.0  ;;  %v2946_v4 = vmax.f32 %v2898_v39, 0.0  ;;  %v2728_v42 = vpop.f32.mrf.mxu2 }
 0x45d   : > { %v2774_v57 = vadd.f32 %v2728_v42, %v5527_v41 }
 0x45e   : > { %v5691_v29 = vpack.c.bf16 %v2945_v17, %v2942_v13  ;;  %v5693_v1 = vpack.c.bf16 %v2946_v4, %v2943_v8 }
 0x45f   : > { %v2902_v3 = vadd.f32 %v5596_v27, %v2774_v57  ;;  %v2630_v37 = vpop.f32.mrf.mxu0  ;;  %v2679_v20 = vpop.f32.mrf.mxu1 }
 0x460   : > { %v2772_v9 = vadd.f32 %v2630_v37, %v5525_v34  ;;  %v2773_v5 = vadd.f32 %v2679_v20, %v5521_v15  ;;  %v5941_v20 = vld [vmem:[#allocation6_spill] sm:$0xff] }
 0x461   : > { %v2950_v34 = vmax.f32 %v2902_v3, 0.0 }
 0x462   : > { %v2900_v53 = vadd.f32 %v5596_v27, %v2772_v9  ;;  %v2901_v23 = vadd.f32 %v5596_v27, %v2773_v5  ;;  %v2444_v40 = vpop.f32.mrf.mxu3 }
 0x463   : > { %v2492_v9 = vadd.f32 %v2444_v40, %v5941_v20 }
 0x464   : > { %v2730_v36 = vpop.f32.mrf.mxu2  ;;  %v2948_v61 = vmax.f32 %v2900_v53, 0.0  ;;  %v2949_v54 = vmax.f32 %v2901_v23, 0.0 }
 0x465   : > { %v2777_v0 = vadd.f32 %v2730_v36, %v2483_v62 }
 0x467   : > { %v2905_v24 = vadd.f32 %v5638_v56, %v2777_v0  ;;  %v2632_v41 = vpop.f32.mrf.mxu0  ;;  %v2681_v33 = vpop.f32.mrf.mxu1 }
 0x468   : > { %v2775_v11 = vadd.f32 %v2632_v41, %v5542_v25  ;;  %v2776_v47 = vadd.f32 %v2681_v33, %v5533_v52 }
 0x469   : > { %v2953_v44 = vmax.f32 %v2905_v24, 0.0 }
 0x46a   : > { %v2903_v15 = vadd.f32 %v5638_v56, %v2775_v11  ;;  %v2904_v30 = vadd.f32 %v5638_v56, %v2776_v47  ;;  %v2489_v56 = vadd.f32 %v2441_v31, %v5566_v16  ;;  %v2446_v62 = vpop.f32.mrf.mxu3  ;;  %v5943_v47 = vld [vmem:[#allocation21_spill] sm:$0xff] }
 0x46b   : > { %v5707_v45 = vpack.c.bf16 %v2953_v44, %v2950_v34  ;;  %v5944_v34 = vld [vmem:[#allocation19_spill] sm:$0xff] }
 0x46c   : > { %v2951_v14 = vmax.f32 %v2903_v15, 0.0  ;;  %v2952_v48 = vmax.f32 %v2904_v30, 0.0  ;;  %v2733_v46 = vpop.f32.mrf.mxu2  ;;  %v5945_v15 = vld [vmem:[#allocation20_spill] sm:$0xff] }
 0x46d   : > { %v2780_v27 = vadd.f32 %v2733_v46, %v2486_v63 }
 0x46e   : > { %v5709_v19 = vpack.c.bf16 %v2951_v14, %v2948_v61  ;;  %v5711_v25 = vpack.c.bf16 %v2952_v48, %v2949_v54  ;;  %v5946_v14 = vld [vmem:[#allocation23_spill] sm:$0xff] }
 0x46f   : > { %v2908_v52 = vadd.f32 %v5625_v32, %v2780_v27  ;;  %v2635_v2 = vpop.f32.mrf.mxu0  ;;  %v2684_v10 = vpop.f32.mrf.mxu1 }
 0x470   : > { %v2778_v6 = vadd.f32 %v2635_v2, %v5552_v35  ;;  %v2779_v28 = vadd.f32 %v2684_v10, %v5546_v50  ;;  %v5947_v10 = vld [vmem:[#allocation13_spill] sm:$0xff] }
 0x471   : > { %v2956_v37 = vmax.f32 %v2908_v52, 0.0 }
 0x472   : > { %v2906_v42 = vadd.f32 %v5625_v32, %v2778_v6  ;;  %v2907_v57 = vadd.f32 %v5625_v32, %v2779_v28  ;;  %v2449_v54 = vpop.f32.mrf.mxu3 }
 0x474   : > { %v2735_v39 = vpop.f32.mrf.mxu2  ;;  %v2954_v36 = vmax.f32 %v2906_v42, 0.0  ;;  %v2955_v0 = vmax.f32 %v2907_v57, 0.0 }
 0x475   : > { %v2783_v13 = vadd.f32 %v2735_v39, %v2489_v56  ;;  %v5948_v56 = vld [vmem:[#allocation22_spill] sm:$0xff] }
 0x477   : > { %v2911_v8 = vadd.f32 %v5589_v18, %v2783_v13  ;;  %v2637_v17 = vpop.f32.mrf.mxu0  ;;  %v2686_v4 = vpop.f32.mrf.mxu1 }
 0x478   : > { %v2781_v7 = vadd.f32 %v2637_v17, %v5569_v38  ;;  %v2782_v3 = vadd.f32 %v2686_v4, %v5560_v26  ;;  %v5942_v26 = vld [vmem:[#allocation12_spill] sm:$0xff] }
 0x479   : > { %v2959_v16 = vmax.f32 %v2911_v8, 0.0 }
 0x47a   : > { %v2909_v35 = vadd.f32 %v5589_v18, %v2781_v7  ;;  %v2910_v50 = vadd.f32 %v5589_v18, %v2782_v3  ;;  %v2495_v18 = vadd.f32 %v2446_v62, %v5943_v47  ;;  %v2451_v62 = vpop.f32.mrf.mxu3 }
 0x47b   : > { %v5725_v5 = vpack.c.bf16 %v2959_v16, %v2956_v37 }
 0x47c   : > { %v2957_v24 = vmax.f32 %v2909_v35, 0.0  ;;  %v2958_v41 = vmax.f32 %v2910_v50, 0.0  ;;  %v2738_v32 = vpop.f32.mrf.mxu2  ;;  %v5949_v35 = vld [vmem:[#allocation11_spill] sm:$0xff] }
 0x47d   : > { %v2786_v33 = vadd.f32 %v2738_v32, %v2492_v9  ;;  %v2498_v50 = vadd.f32 %v2449_v54, %v5949_v35 }
 0x47e   : > { %v2987_v38 = vpack.c.bf16 %v2957_v24, %v2954_v36  ;;  %v5727_v31 = vpack.c.bf16 %v2958_v41, %v2955_v0  ;;  %v5950_v0 = vld [vmem:[#allocation17_spill] sm:$0xff]  ;;  %v5951_v41 = vld [vmem:[#allocation16_spill] sm:$0xff] }
 0x47f   : > { %v2914_v53 = vadd.f32 %v5942_v26, %v2786_v33  ;;  %v2640_v23 = vpop.f32.mrf.mxu0  ;;  %v2689_v11 = vpop.f32.mrf.mxu1  ;;  %v2501_v24 = vadd.f32 %v2451_v62, %v5950_v0  ;;  %v5952_v33 = vld [vmem:[#allocation15_spill] sm:$0xff] }
 0x480   : > { %v2784_v44 = vadd.f32 %v2640_v23, %v5944_v34  ;;  %v2785_v30 = vadd.f32 %v2689_v11, %v5945_v15  ;;  %v5953_v23 = vld [vmem:[#allocation10_spill] sm:$0xff] }
 0x481   : > { %v2962_v28 = vmax.f32 %v2914_v53, 0.0 }
 0x482   : > { %v2912_v52 = vadd.f32 %v5942_v26, %v2784_v44  ;;  %v2913_v2 = vadd.f32 %v5942_v26, %v2785_v30 }
 0x484   : > { %v2740_v63 = vpop.f32.mrf.mxu2  ;;  %v2960_v4 = vmax.f32 %v2912_v52, 0.0  ;;  %v2961_v42 = vmax.f32 %v2913_v2, 0.0 }
 0x485   : > { %v2789_v61 = vadd.f32 %v2740_v63, %v2495_v18  ;;  %v5954_v18 = vld [vmem:[#allocation27_spill] sm:$0xff] }
 0x487   : > { %v2917_v48 = vadd.f32 %v5946_v14, %v2789_v61  ;;  %v2642_v46 = vpop.f32.mrf.mxu0  ;;  %v2691_v27 = vpop.f32.mrf.mxu1  ;;  %v5955_v61 = vld [vmem:[#allocation25_spill] sm:$0xff] }
 0x488   : > { %v2787_v40 = vadd.f32 %v2642_v46, %v5947_v10  ;;  %v2788_v6 = vadd.f32 %v2691_v27, %v5948_v56 }
 0x489   : > { %v2965_v39 = vmax.f32 %v2917_v48, 0.0 }
 0x48a   : > { %v2915_v13 = vadd.f32 %v5946_v14, %v2787_v40  ;;  %v2916_v8 = vadd.f32 %v5946_v14, %v2788_v6  ;;  %v5956_v14 = vld [vmem:[#allocation24_spill] sm:$0xff] }
 0x48b   : > { %v2992_v17 = vpack.c.bf16 %v2965_v39, %v2962_v28 }
 0x48c   : > { %v2963_v57 = vmax.f32 %v2915_v13, 0.0  ;;  %v2964_v7 = vmax.f32 %v2916_v8, 0.0  ;;  %v2743_v3 = vpop.f32.mrf.mxu2  ;;  %v242_v8 = vld [vmem:[%s5807_s3] sm:$0x1] }
 0x48d   : > { %v2792_v36 = vadd.f32 %v2743_v3, %v2498_v50 }
 0x48e   : > { %v2990_v37 = vpack.c.bf16 %v2963_v57, %v2960_v4  ;;  %v2991_v16 = vpack.c.bf16 %v2964_v7, %v2961_v42 }
 0x48f   : > { %v2645_v20 = vpop.f32.mrf.mxu0  ;;  %v2694_v9 = vpop.f32.mrf.mxu1  ;;  %v2920_v11 = vadd.f32 %v5953_v23, %v2792_v36 }
 0x490   : > { %v2790_v32 = vadd.f32 %v2645_v20, %v5951_v41  ;;  %v2791_v26 = vadd.f32 %v2694_v9, %v5952_v33 }
 0x491   : > { %v2968_v46 = vmax.f32 %v2920_v11, 0.0 }
 0x492   : > { %v2918_v30 = vadd.f32 %v5953_v23, %v2790_v32  ;;  %v2919_v63 = vadd.f32 %v5953_v23, %v2791_v26 }
 0x494   : > { %v2745_v53 = vpop.f32.mrf.mxu2  ;;  %v2966_v40 = vmax.f32 %v2918_v30, 0.0  ;;  %v2967_v56 = vmax.f32 %v2919_v63, 0.0 }
 0x495   : > { %v2795_v47 = vadd.f32 %v2745_v53, %v2501_v24 }
 0x497   : > { %v2923_v34 = vadd.f32 %v5954_v18, %v2795_v47  ;;  %v2647_v44 = vpop.f32.mrf.mxu0  ;;  %v2696_v15 = vpop.f32.mrf.mxu1 }
 0x498   : > { %v2793_v54 = vadd.f32 %v2647_v44, %v5955_v61  ;;  %v2794_v48 = vadd.f32 %v2696_v15, %v5956_v14 }
 0x499   : > { %v2971_v27 = vmax.f32 %v2923_v34, 0.0 }
 0x49a   : > { %v2921_v52 = vadd.f32 %v5954_v18, %v2793_v54  ;;  %v2922_v2 = vadd.f32 %v5954_v18, %v2794_v48 }
 0x49b   : > { %v2995_v10 = vpack.c.bf16 %v2971_v27, %v2968_v46 }
 0x49c   : > { %v2969_v6 = vmax.f32 %v2921_v52, 0.0  ;;  %v2970_v28 = vmax.f32 %v2922_v2, 0.0 }
 0x49e   : > { %v2993_v39 = vpack.c.bf16 %v2969_v6, %v2966_v40  ;;  %v2994_v13 = vpack.c.bf16 %v2970_v28, %v2967_v56 }
 0x4a0   : > { %3002 = vmatpush.bf16.msra.mxu3 %v2993_v39 }
 0x4a4   : > { %3003 = vmatpush.bf16.msra.mxu3 %v2990_v37 }
 0x4a8   : > { %3004 = vmatpush.bf16.msra.mxu3 %v2987_v38 }
 0x4ac   : > { %3005 = vmatpush.bf16.msra.mxu3 %v5709_v19 }
 0x4b0   : > { %3006 = vmatpush.bf16.msra.mxu3 %v5691_v29 }
 0x4b4   : > { %3007 = vmatpush.bf16.msra.mxu3 %v5673_v12  ;;  %v2999_v12 = vpop.permute.xlu2 %2998 }
 0x4b8   : > { %3008 = vmatpush.bf16.msra.mxu3 %v5658_v58 }
 0x4bc   : > { %3009 = vmatpush.bf16.msra.mxu3 %v5646_v60 }
 0x4bf   : > { %3010 = vmatmul.bf16.vlgmr.msra.gmra.mxu3 %v242_v8 }
 0x4c0   : > { %3015 = vmatpush.bf16.msrb.mxu3 %v2994_v13 }
 0x4c4   : > { %3016 = vmatpush.bf16.msrb.mxu3 %v2991_v16 }
 0x4c8   : > { %3017 = vmatpush.bf16.msrb.mxu3 %v5727_v31 }
 0x4cc   : > { %3018 = vmatpush.bf16.msrb.mxu3 %v5711_v25 }
 0x4d0   : > { %3019 = vmatpush.bf16.msrb.mxu3 %v5693_v1 }
 0x4d4   : > { %3020 = vmatpush.bf16.msrb.mxu3 %v5675_v55  ;;  %v3001_v55 = vperm.slane %v2999_v12, 0 }
 0x4d8   : > { %3021 = vmatpush.bf16.msrb.mxu3 %v5660_v21 }
 0x4dc   : > { %3022 = vmatpush.bf16.msrb.mxu3 %v5648_v22 }
 0x4df   : > { %3023 = vmatmul.bf16.vlgmr.msrb.gmra.mxu3 %v242_v8 }
 0x4e0   : > { %3028 = vmatpush.bf16.msra.mxu3 %v2995_v10 }
 0x4e4   : > { %3029 = vmatpush.bf16.msra.mxu3 %v2992_v17 }
 0x4e8   : > { %3030 = vmatpush.bf16.msra.mxu3 %v5725_v5 }
 0x4ec   : > { %3031 = vmatpush.bf16.msra.mxu3 %v5707_v45 }
 0x4f0   : > { %3032 = vmatpush.bf16.msra.mxu3 %v5688_v43 }
 0x4f4   : > { %3033 = vmatpush.bf16.msra.mxu3 %v5670_v49  ;;  %v3051_v49 = vlaneseq }
 0x4f6   : > { %vm3053_vm12 = vcmp.lt.s32.totalorder %v3051_v49, 288 }
 0x4f8   : > { %3034 = vmatpush.bf16.msra.mxu3 %v5655_v59 }
 0x4fc   : > { %3035 = vmatpush.bf16.msra.mxu3 %v5643_v51 }
 0x4ff   : > { %3036 = vmatmul.bf16.vlgmr.msra.gmra.mxu3 %v242_v8 }
 0x542   : > { %v3011_v60 = vpop.f32.mrf.mxu3 }
 0x543   : > { %v3012_v1 = vadd.f32 %v3011_v60, %v3001_v55 }
 0x54a   : > { %v3013_v58 = vpop.f32.mrf.mxu3 }
 0x562   : > { %v3024_v22 = vpop.f32.mrf.mxu3 }
 0x563   : > { %v3025_v29 = vadd.f32 %v3024_v22, %v3001_v55 }
 0x565   : > { %v3044_v43 = vrot.slane %v3025_v29, 7 }
 0x567   : > { %v3047_v19 = vsel %vm3046_vm10, %v3012_v1, %v3044_v43 }
 0x56a   : > { %v3026_v21 = vpop.f32.mrf.mxu3 }
 0x582   : > { %v3037_v59 = vpop.f32.mrf.mxu3 }
 0x583   : > { %v3038_v51 = vadd.f32 %v3037_v59, %v3001_v55 }
 0x585   : > { %v3045_v45 = vrot.slane %v3038_v51, 6 }
 0x587   : > { %v3049_v25 = vsel %vm3048_vm11, %v3047_v19, %v3045_v45 }
 0x588   : > { %3055 = vst.msk [vmem:[%s219_s16] sm:$0x7] %vm3053_vm12, %v3049_v25 }
 0x589   : > { %3923 = shalt.err (!%p3920_p3)
}
 0x58a   : > { %3845 = dma.vmem_to_hbm [thread:$0]  (%p4040_p5), %s3070_s17, 48, %s3072_s18, %s3057_s4   ;;  %v3039_v5 = vpop.f32.mrf.mxu3 }
 0x58b PF: > { %p3851_p4 = scmp.ge.s32.totalorder %s3958_s23, 2  ;;  %s3083_s9 = sand.u32 1, %s3946_s20  }
 0x58c   : > { %s3084_s10 = scalar_lea.sflag [#allocation4], %s3083_s9 }
 0x58d   : > { %p3848_p7 = pnand %p3851_p4, %p4044_p6 }
 0x58f   : > { %p3849_p8 = pneg %p3848_p7 }
 0x591   : > { %3941 = dma.done.wait (%p3849_p8), %s3084_s10, 48  }
 0x592   : > { %3943 = vsyncadd (%p3849_p8), %s3084_s10, 4294967248  ;;  %p17_p9 = scmp.ge.s32.totalorder %s4027_s25, 4   ;;  %s5957_s20 = smov %s3950_s21 }
 0x593   : > { %s5958_s21 = smov %s3954_s22  ;;  %s5959_s22 = smov %s4038_s28 }
 0x594   : > { %s5960_s23 = smov %s4027_s25  ;;  %19 = sbr.rel (!%p17_p9) target bundleno = 6 (0x6), region = 83 }
 0x599   :  { %3090 = vsyncpa [#allocation4], 1 }
 0x59a   :  { %3092 = vsyncpa [#allocation4 + $0x1], 1 }

</bundles_post_ra>
